<compile_context>
chip_gen: v7x
topology: tpu7x:2x2x1
jax: 0.10.0
libtpu: 0.0.40
codegen_flags: <defaults>
</compile_context>

<pallas_src>
import functools

import jax
import jax.numpy as jnp
from jax.experimental import pallas as pl
from jax.experimental.pallas import tpu as pltpu


def _layer_norm(z, gamma, beta, eps=1e-3):
    # matches LayerNormalization: torch.std is unbiased (ddof=1), eps added to sigma.
    d = z.shape[-1]
    mu = jnp.mean(z, axis=-1, keepdims=True)
    var = jnp.sum((z - mu) ** 2, axis=-1, keepdims=True) * (1.0 / (d - 1))
    inv = pl.reciprocal(jnp.sqrt(var) + eps, approx=True)
    return (z - mu) * inv * gamma + beta


def encoder_layer_kernel(x_ref, wq_ref, wk_ref, wv_ref, wo_ref, bo_ref,
                         g1_ref, be1_ref, w1_ref, b1_ref, w2_ref, b2_ref,
                         g2_ref, be2_ref, out_ref, attn_ref, *, n_head, d_k, d_v):
    x = x_ref[0]                                      # (L, D) f32
    L, D = x.shape
    x_bf = x.astype(jnp.bfloat16)

    # ---- fused, lane-dense Q/K/V projections (bf16 MXU inputs, f32 accumulation) ----
    # 1/temper has already been folded into wq by the wrapper.
    q_all = jnp.dot(x_bf, wq_ref[...], preferred_element_type=jnp.float32)   # (L, H*d_k)
    k_all = jnp.dot(x_bf, wk_ref[...], preferred_element_type=jnp.float32)   # (L, H*d_k)
    v_all = jnp.dot(x_bf, wv_ref[...], preferred_element_type=jnp.float32)   # (L, H*d_v)
    wo = wo_ref[...]                                                          # (H*d_v, D) bf16

    # ---- per-head attention, accumulating the output projection (no concat) ----
    acc = jnp.zeros((L, D), jnp.float32)
    for h in range(n_head):                           # n_head is small & static -> unrolled
        q_h = q_all[:, h * d_k:(h + 1) * d_k].astype(jnp.bfloat16)   # (L, d_k)
        k_h = k_all[:, h * d_k:(h + 1) * d_k].astype(jnp.bfloat16)   # (L, d_k)
        v_h = v_all[:, h * d_v:(h + 1) * d_v].astype(jnp.bfloat16)   # (L, d_v)

        # scores = Q_h K_h^T (contraction over d_k, no explicit transpose)
        scores = jax.lax.dot_general(q_h, k_h, (((1,), (1,)), ((), ())),
                                     preferred_element_type=jnp.float32)     # (L, L)
        # TODO(synk): attn_mask / output_mask / position_dpa / sentence_words are None /
        # disabled in this forward path, so they are not applied here.
        m = jnp.max(scores, axis=-1, keepdims=True)
        e = jnp.exp(scores - m)
        attn = e * pl.reciprocal(jnp.sum(e, axis=-1, keepdims=True), approx=True)
        attn_ref[h, 0] = attn.astype(attn_ref.dtype)                         # head-major write

        head = jnp.dot(attn.astype(jnp.bfloat16), v_h,
                       preferred_element_type=jnp.float32)                   # (L, d_v)
        acc = acc + jnp.dot(head.astype(jnp.bfloat16),
                            wo[h * d_v:(h + 1) * d_v, :],
                            preferred_element_type=jnp.float32)              # (L, D)

    proj = acc + bo_ref[...]
    # TODO(synk): dropout / scaled_dropout are identity in eval mode -> omitted.
    attn_out = _layer_norm(proj + x, g1_ref[...], be1_ref[...])              # (L, D)

    # ---- position-wise feed-forward (Conv1d k=1 == per-position Linear) ----
    h1 = jnp.maximum(
        jnp.dot(attn_out.astype(jnp.bfloat16), w1_ref[...],
                preferred_element_type=jnp.float32) + b1_ref[...], 0.0)      # (L, d_inner)
    ff = jnp.dot(h1.astype(jnp.bfloat16), w2_ref[...],
                 preferred_element_type=jnp.float32) + b2_ref[...]
    # residual_bool=False -> pos_ffn residual is its own input (attn_out).
    out = _layer_norm(ff + attn_out, g2_ref[...], be2_ref[...])
    out_ref[0] = out.astype(out_ref.dtype)


def encoder_layer(x, params, *, n_head, temper_value=0.5):
    B, L, D = x.shape
    temper = float(D) ** temper_value       # classic ScaledDotProductAttention: d_model**0.5
    d_k = params['w_qs'].shape[-1]
    d_v = params['w_vs'].shape[-1]

    # --- one-time, wrapper-side weight prep (lane-dense + bf16 + temper folding) ---
    wq = (jnp.transpose(params['w_qs'], (1, 0, 2)).reshape(D, n_head * d_k)
          * (1.0 / temper)).astype(jnp.bfloat16)
    wk = jnp.transpose(params['w_ks'], (1, 0, 2)).reshape(D, n_head * d_k).astype(jnp.bfloat16)
    wv = jnp.transpose(params['w_vs'], (1, 0, 2)).reshape(D, n_head * d_v).astype(jnp.bfloat16)
    wo = params['w_o'].astype(jnp.bfloat16)
    w1 = params['w_1'].astype(jnp.bfloat16)
    w2 = params['w_2'].astype(jnp.bfloat16)

    args = [x, wq, wk, wv, wo, params['b_o'], params['ln1_g'], params['ln1_b'],
            w1, params['b_1'], w2, params['b_2'], params['ln2_g'], params['ln2_b']]

    def full(a):
        shp = a.shape
        return pl.BlockSpec(shp, lambda b, _s=shp: (0,) * len(_s))

    in_specs = [pl.BlockSpec((1, L, D), lambda b: (b, 0, 0))] + [full(a) for a in args[1:]]
    # Attention output is produced directly in head-major (n_head, B, L, L) layout.
    out_specs = (pl.BlockSpec((1, L, D), lambda b: (b, 0, 0)),
                 pl.BlockSpec((n_head, 1, L, L), lambda b: (0, b, 0, 0)))
    out_shape = (jax.ShapeDtypeStruct((B, L, D), x.dtype),
                 jax.ShapeDtypeStruct((n_head, B, L, L), x.dtype))

    kernel = functools.partial(encoder_layer_kernel, n_head=n_head, d_k=d_k, d_v=d_v)

    f = pl.pallas_call(
        kernel,
        out_shape=out_shape,
        grid_spec=pltpu.PrefetchScalarGridSpec(
            num_scalar_prefetch=0,
            grid=(B,),
            in_specs=in_specs,
            out_specs=out_specs),
        compiler_params=pltpu.CompilerParams(dimension_semantics=("parallel",)),
    )
    enc_out, attn = f(*args)
    # Classic MultiHeadAttention returns attns head-major: (n_head*B, L, L).
    # The kernel already wrote head-major, so this reshape is a free view (no transpose).
    enc_slf_attn = attn.reshape(n_head * B, L, L)
    return enc_out, enc_slf_attn


# ----------------------------- pure-JAX reference (f32) ------------------------------
def encoder_layer_ref(x, params, *, n_head, temper_value=0.5):
    B, L, D = x.shape
    temper = float(D) ** temper_value

    def ln(z, g, b, eps=1e-3):
        mu = jnp.mean(z, -1, keepdims=True)
        var = jnp.sum((z - mu) ** 2, -1, keepdims=True) / (z.shape[-1] - 1)
        return (z - mu) / (jnp.sqrt(var) + eps) * g + b

    q = jnp.einsum('bld,hdk->hblk', x, params['w_qs'])
    k = jnp.einsum('bld,hdk->hblk', x, params['w_ks'])
    v = jnp.einsum('bld,hdk->hblk', x, params['w_vs'])
    scores = jnp.einsum('hbqd,hbkd->hbqk', q, k) / temper
    attn = jax.nn.softmax(scores, axis=-1)                             # (H, B, L, L)
    head = jnp.einsum('hbqk,hbkd->hbqd', attn, v)                      # (H, B, L, d_v)
    concat = jnp.transpose(head, (1, 2, 0, 3)).reshape(B, L, -1)       # (B, L, H*d_v)
    proj = concat @ params['w_o'] + params['b_o']
    attn_out = ln(proj + x, params['ln1_g'], params['ln1_b'])
    h1 = jnp.maximum(attn_out @ params['w_1'] + params['b_1'], 0.0)
    ff = h1 @ params['w_2'] + params['b_2']
    out = ln(ff + attn_out, params['ln2_g'], params['ln2_b'])
    return out, attn.reshape(n_head * B, L, L)


def init_params(key, d_model, d_inner, n_head, d_k, d_v):
    ks = jax.random.split(key, 6)

    def xavier(k, shape, fan_in, fan_out):
        std = (2.0 / (fan_in + fan_out)) ** 0.5
        return (std * jax.random.normal(k, shape)).astype(jnp.float32)

    return {
        # head-stacked projection weights, as in the classic bmm formulation
        'w_qs': xavier(ks[0], (n_head, d_model, d_k), d_model, d_k),
        'w_ks': xavier(ks[1], (n_head, d_model, d_k), d_model, d_k),
        'w_vs': xavier(ks[2], (n_head, d_model, d_v), d_model, d_v),
        'w_o':  xavier(ks[3], (n_head * d_v, d_model), n_head * d_v, d_model),
        'b_o':  jnp.zeros((1, d_model), jnp.float32),
        'ln1_g': jnp.ones((1, d_model), jnp.float32),
        'ln1_b': jnp.zeros((1, d_model), jnp.float32),
        # Conv1d(d_model, d_inner, 1) weight stored transposed as (d_model, d_inner)
        'w_1':  xavier(ks[4], (d_model, d_inner), d_model, d_inner),
        'b_1':  jnp.zeros((1, d_inner), jnp.float32),
        'w_2':  xavier(ks[5], (d_inner, d_model), d_inner, d_model),
        'b_2':  jnp.zeros((1, d_model), jnp.float32),
        'ln2_g': jnp.ones((1, d_model), jnp.float32),
        'ln2_b': jnp.zeros((1, d_model), jnp.float32),
    }


if __name__ == "__main__":
    B, L = 2, 8
    d_model, d_inner, n_head, d_k, d_v = 32, 64, 4, 8, 8

    key = jax.random.PRNGKey(0)
    k_x, k_p = jax.random.split(key)
    enc_input = jax.random.normal(k_x, (B, L, d_model), dtype=jnp.float32)
    params = init_params(k_p, d_model, d_inner, n_head, d_k, d_v)

    enc_output, enc_slf_attn = encoder_layer(enc_input, params, n_head=n_head)
    enc_output = jax.block_until_ready(enc_output)
    enc_slf_attn = jax.block_until_ready(enc_slf_attn)

    assert enc_output.shape == (B, L, d_model)
    assert enc_slf_attn.shape == (n_head * B, L, L)
    assert bool(jnp.all(jnp.isfinite(enc_output)))
    # attention rows sum to ~1 (approx reciprocal in softmax -> relaxed tolerance)
    assert bool(jnp.allclose(jnp.sum(enc_slf_attn, axis=-1), 1.0, atol=1e-2))

    # loose comparison against an f32 pure-JAX reference (kernel uses bf16 MXU inputs)
    ref_out, ref_attn = encoder_layer_ref(enc_input, params, n_head=n_head)
    assert bool(jnp.max(jnp.abs(enc_output - ref_out)) < 0.2)
    assert bool(jnp.max(jnp.abs(enc_slf_attn - ref_attn)) < 0.05)

    print("KERNEL_OK")
</pallas_src>

<mosaic_0001>
module attributes {stable_mosaic.version = 11 : i64} {
  func.func @encoder_layer_kernel(%arg0: i32, %arg1: memref<1x8x32xf32, #tpu.memory_space<vmem>>, %arg2: memref<32x32xbf16, #tpu.memory_space<vmem>>, %arg3: memref<32x32xbf16, #tpu.memory_space<vmem>>, %arg4: memref<32x32xbf16, #tpu.memory_space<vmem>>, %arg5: memref<32x32xbf16, #tpu.memory_space<vmem>>, %arg6: memref<1x32xf32, #tpu.memory_space<vmem>>, %arg7: memref<1x32xf32, #tpu.memory_space<vmem>>, %arg8: memref<1x32xf32, #tpu.memory_space<vmem>>, %arg9: memref<32x64xbf16, #tpu.memory_space<vmem>>, %arg10: memref<1x64xf32, #tpu.memory_space<vmem>>, %arg11: memref<64x32xbf16, #tpu.memory_space<vmem>>, %arg12: memref<1x32xf32, #tpu.memory_space<vmem>>, %arg13: memref<1x32xf32, #tpu.memory_space<vmem>>, %arg14: memref<1x32xf32, #tpu.memory_space<vmem>>, %arg15: memref<1x8x32xf32, #tpu.memory_space<vmem>>, %arg16: memref<4x1x8x8xf32, #tpu.memory_space<vmem>>) attributes {dimension_semantics = [#tpu.dimension_semantics<parallel>], iteration_bounds = array<i64: 2>, scalar_prefetch = 0 : i64, scratch_operands = 0 : i64, tpu.core_type = #tpu.core_type<tc>, window_params = [{transform_indices = @transform_0, window_bounds = array<i64: 1, 8, 32>}, {pipeline_mode = #tpu.pipeline_mode<synchronous>, transform_indices = @transform_1, window_bounds = array<i64: 32, 32>}, {pipeline_mode = #tpu.pipeline_mode<synchronous>, transform_indices = @transform_2, window_bounds = array<i64: 32, 32>}, {pipeline_mode = #tpu.pipeline_mode<synchronous>, transform_indices = @transform_3, window_bounds = array<i64: 32, 32>}, {pipeline_mode = #tpu.pipeline_mode<synchronous>, transform_indices = @transform_4, window_bounds = array<i64: 32, 32>}, {pipeline_mode = #tpu.pipeline_mode<synchronous>, transform_indices = @transform_5, window_bounds = array<i64: 1, 32>}, {pipeline_mode = #tpu.pipeline_mode<synchronous>, transform_indices = @transform_6, window_bounds = array<i64: 1, 32>}, {pipeline_mode = #tpu.pipeline_mode<synchronous>, transform_indices = @transform_7, window_bounds = array<i64: 1, 32>}, {pipeline_mode = #tpu.pipeline_mode<synchronous>, transform_indices = @transform_8, window_bounds = array<i64: 32, 64>}, {pipeline_mode = #tpu.pipeline_mode<synchronous>, transform_indices = @transform_9, window_bounds = array<i64: 1, 64>}, {pipeline_mode = #tpu.pipeline_mode<synchronous>, transform_indices = @transform_10, window_bounds = array<i64: 64, 32>}, {pipeline_mode = #tpu.pipeline_mode<synchronous>, transform_indices = @transform_11, window_bounds = array<i64: 1, 32>}, {pipeline_mode = #tpu.pipeline_mode<synchronous>, transform_indices = @transform_12, window_bounds = array<i64: 1, 32>}, {pipeline_mode = #tpu.pipeline_mode<synchronous>, transform_indices = @transform_13, window_bounds = array<i64: 1, 32>}, {transform_indices = @transform_14, window_bounds = array<i64: 1, 8, 32>}, {transform_indices = @transform_15, window_bounds = array<i64: 4, 1, 8, 8>}]} {
    %c0 = arith.constant 0 : index
    %c0_0 = arith.constant 0 : index
    %c0_1 = arith.constant 0 : index
    %0 = vector.load %arg1[%c0, %c0_0, %c0_1] : memref<1x8x32xf32, #tpu.memory_space<vmem>>, vector<1x8x32xf32>
    %1 = vector.shape_cast %0 : vector<1x8x32xf32> to vector<8x32xf32>
    %2 = arith.truncf %1 : vector<8x32xf32> to vector<8x32xbf16>
    %c0_2 = arith.constant 0 : index
    %c0_3 = arith.constant 0 : index
    %3 = vector.load %arg2[%c0_2, %c0_3] : memref<32x32xbf16, #tpu.memory_space<vmem>>, vector<32x32xbf16>
    %cst = arith.constant dense<0.000000e+00> : vector<8x32xf32>
    %4 = tpu.matmul %2, %3, %cst {dimension_numbers = #tpu.dot_dimension_numbers<[1], [0], [0], [1], [0, 0, 1, 1], [], []>} : vector<8x32xbf16>, vector<32x32xbf16>, vector<8x32xf32> -> vector<8x32xf32>
    %c0_4 = arith.constant 0 : index
    %c0_5 = arith.constant 0 : index
    %5 = vector.load %arg3[%c0_4, %c0_5] : memref<32x32xbf16, #tpu.memory_space<vmem>>, vector<32x32xbf16>
    %cst_6 = arith.constant dense<0.000000e+00> : vector<8x32xf32>
    %6 = tpu.matmul %2, %5, %cst_6 {dimension_numbers = #tpu.dot_dimension_numbers<[1], [0], [0], [1], [0, 0, 1, 1], [], []>} : vector<8x32xbf16>, vector<32x32xbf16>, vector<8x32xf32> -> vector<8x32xf32>
    %c0_7 = arith.constant 0 : index
    %c0_8 = arith.constant 0 : index
    %7 = vector.load %arg4[%c0_7, %c0_8] : memref<32x32xbf16, #tpu.memory_space<vmem>>, vector<32x32xbf16>
    %cst_9 = arith.constant dense<0.000000e+00> : vector<8x32xf32>
    %8 = tpu.matmul %2, %7, %cst_9 {dimension_numbers = #tpu.dot_dimension_numbers<[1], [0], [0], [1], [0, 0, 1, 1], [], []>} : vector<8x32xbf16>, vector<32x32xbf16>, vector<8x32xf32> -> vector<8x32xf32>
    %c0_10 = arith.constant 0 : index
    %c0_11 = arith.constant 0 : index
    %9 = vector.load %arg5[%c0_10, %c0_11] : memref<32x32xbf16, #tpu.memory_space<vmem>>, vector<32x32xbf16>
    %cst_12 = arith.constant 0.000000e+00 : f32
    %10 = vector.broadcast %cst_12 : f32 to vector<8x32xf32>
    %11 = vector.extract_strided_slice %4 {offsets = [0, 0], sizes = [8, 8], strides = [1, 1]} : vector<8x32xf32> to vector<8x8xf32>
    %12 = arith.truncf %11 : vector<8x8xf32> to vector<8x8xbf16>
    %13 = vector.extract_strided_slice %6 {offsets = [0, 0], sizes = [8, 8], strides = [1, 1]} : vector<8x32xf32> to vector<8x8xf32>
    %14 = arith.truncf %13 : vector<8x8xf32> to vector<8x8xbf16>
    %15 = vector.extract_strided_slice %8 {offsets = [0, 0], sizes = [8, 8], strides = [1, 1]} : vector<8x32xf32> to vector<8x8xf32>
    %16 = arith.truncf %15 : vector<8x8xf32> to vector<8x8xbf16>
    %cst_13 = arith.constant dense<0.000000e+00> : vector<8x8xf32>
    %17 = tpu.matmul %12, %14, %cst_13 {dimension_numbers = #tpu.dot_dimension_numbers<[1], [1], [0], [0], [0, 0, 1, 0], [], []>} : vector<8x8xbf16>, vector<8x8xbf16>, vector<8x8xf32> -> vector<8x8xf32>
    %cst_14 = arith.constant dense<0xFF800000> : vector<8xf32>
    %18 = vector.multi_reduction <maximumf>, %17, %cst_14 [1] : vector<8x8xf32> to vector<8xf32>
    %19 = vector.shape_cast %18 : vector<8xf32> to vector<8x1xf32>
    %20 = vector.broadcast %19 : vector<8x1xf32> to vector<8x8xf32>
    %21 = arith.subf %17, %20 : vector<8x8xf32>
    %22 = math.exp %21 : vector<8x8xf32>
    %cst_15 = arith.constant dense<0.000000e+00> : vector<8xf32>
    %23 = vector.multi_reduction <add>, %22, %cst_15 [1] : vector<8x8xf32> to vector<8xf32>
    %24 = vector.shape_cast %23 : vector<8xf32> to vector<8x1xf32>
    %25 = tpu.reciprocal %24 {approx = true} : vector<8x1xf32> -> vector<8x1xf32>
    %26 = vector.broadcast %25 : vector<8x1xf32> to vector<8x8xf32>
    %27 = arith.mulf %22, %26 : vector<8x8xf32>
    %c0_16 = arith.constant 0 : index
    %c0_17 = arith.constant 0 : index
    %c0_18 = arith.constant 0 : index
    %c0_19 = arith.constant 0 : index
    %28 = vector.load %arg16[%c0_16, %c0_17, %c0_18, %c0_19] : memref<4x1x8x8xf32, #tpu.memory_space<vmem>>, vector<1x1x8x8xf32>
    %29 = vector.shape_cast %28 : vector<1x1x8x8xf32> to vector<8x8xf32>
    %30 = vector.shape_cast %27 : vector<8x8xf32> to vector<1x1x8x8xf32>
    tpu.vector_store %arg16[%c0_16, %c0_17, %c0_18, %c0_19], %30 {strides = array<i32>} : memref<4x1x8x8xf32, #tpu.memory_space<vmem>>, vector<1x1x8x8xf32>,
    %31 = arith.truncf %27 : vector<8x8xf32> to vector<8x8xbf16>
    %cst_20 = arith.constant dense<0.000000e+00> : vector<8x8xf32>
    %32 = tpu.matmul %31, %16, %cst_20 {dimension_numbers = #tpu.dot_dimension_numbers<[1], [0], [0], [1], [0, 0, 1, 1], [], []>} : vector<8x8xbf16>, vector<8x8xbf16>, vector<8x8xf32> -> vector<8x8xf32>
    %33 = arith.truncf %32 : vector<8x8xf32> to vector<8x8xbf16>
    %34 = vector.extract_strided_slice %9 {offsets = [0, 0], sizes = [8, 32], strides = [1, 1]} : vector<32x32xbf16> to vector<8x32xbf16>
    %cst_21 = arith.constant dense<0.000000e+00> : vector<8x32xf32>
    %35 = tpu.matmul %33, %34, %cst_21 {dimension_numbers = #tpu.dot_dimension_numbers<[1], [0], [0], [1], [0, 0, 1, 1], [], []>} : vector<8x8xbf16>, vector<8x32xbf16>, vector<8x32xf32> -> vector<8x32xf32>
    %36 = arith.addf %10, %35 : vector<8x32xf32>
    %37 = vector.extract_strided_slice %4 {offsets = [0, 8], sizes = [8, 8], strides = [1, 1]} : vector<8x32xf32> to vector<8x8xf32>
    %38 = arith.truncf %37 : vector<8x8xf32> to vector<8x8xbf16>
    %39 = vector.extract_strided_slice %6 {offsets = [0, 8], sizes = [8, 8], strides = [1, 1]} : vector<8x32xf32> to vector<8x8xf32>
    %40 = arith.truncf %39 : vector<8x8xf32> to vector<8x8xbf16>
    %41 = vector.extract_strided_slice %8 {offsets = [0, 8], sizes = [8, 8], strides = [1, 1]} : vector<8x32xf32> to vector<8x8xf32>
    %42 = arith.truncf %41 : vector<8x8xf32> to vector<8x8xbf16>
    %cst_22 = arith.constant dense<0.000000e+00> : vector<8x8xf32>
    %43 = tpu.matmul %38, %40, %cst_22 {dimension_numbers = #tpu.dot_dimension_numbers<[1], [1], [0], [0], [0, 0, 1, 0], [], []>} : vector<8x8xbf16>, vector<8x8xbf16>, vector<8x8xf32> -> vector<8x8xf32>
    %cst_23 = arith.constant dense<0xFF800000> : vector<8xf32>
    %44 = vector.multi_reduction <maximumf>, %43, %cst_23 [1] : vector<8x8xf32> to vector<8xf32>
    %45 = vector.shape_cast %44 : vector<8xf32> to vector<8x1xf32>
    %46 = vector.broadcast %45 : vector<8x1xf32> to vector<8x8xf32>
    %47 = arith.subf %43, %46 : vector<8x8xf32>
    %48 = math.exp %47 : vector<8x8xf32>
    %cst_24 = arith.constant dense<0.000000e+00> : vector<8xf32>
    %49 = vector.multi_reduction <add>, %48, %cst_24 [1] : vector<8x8xf32> to vector<8xf32>
    %50 = vector.shape_cast %49 : vector<8xf32> to vector<8x1xf32>
    %51 = tpu.reciprocal %50 {approx = true} : vector<8x1xf32> -> vector<8x1xf32>
    %52 = vector.broadcast %51 : vector<8x1xf32> to vector<8x8xf32>
    %53 = arith.mulf %48, %52 : vector<8x8xf32>
    %c1 = arith.constant 1 : index
    %c0_25 = arith.constant 0 : index
    %c0_26 = arith.constant 0 : index
    %c0_27 = arith.constant 0 : index
    %54 = vector.load %arg16[%c1, %c0_25, %c0_26, %c0_27] : memref<4x1x8x8xf32, #tpu.memory_space<vmem>>, vector<1x1x8x8xf32>
    %55 = vector.shape_cast %54 : vector<1x1x8x8xf32> to vector<8x8xf32>
    %56 = vector.shape_cast %53 : vector<8x8xf32> to vector<1x1x8x8xf32>
    tpu.vector_store %arg16[%c1, %c0_25, %c0_26, %c0_27], %56 {strides = array<i32>} : memref<4x1x8x8xf32, #tpu.memory_space<vmem>>, vector<1x1x8x8xf32>,
    %57 = arith.truncf %53 : vector<8x8xf32> to vector<8x8xbf16>
    %cst_28 = arith.constant dense<0.000000e+00> : vector<8x8xf32>
    %58 = tpu.matmul %57, %42, %cst_28 {dimension_numbers = #tpu.dot_dimension_numbers<[1], [0], [0], [1], [0, 0, 1, 1], [], []>} : vector<8x8xbf16>, vector<8x8xbf16>, vector<8x8xf32> -> vector<8x8xf32>
    %59 = arith.truncf %58 : vector<8x8xf32> to vector<8x8xbf16>
    %60 = vector.extract_strided_slice %9 {offsets = [8, 0], sizes = [8, 32], strides = [1, 1]} : vector<32x32xbf16> to vector<8x32xbf16>
    %cst_29 = arith.constant dense<0.000000e+00> : vector<8x32xf32>
    %61 = tpu.matmul %59, %60, %cst_29 {dimension_numbers = #tpu.dot_dimension_numbers<[1], [0], [0], [1], [0, 0, 1, 1], [], []>} : vector<8x8xbf16>, vector<8x32xbf16>, vector<8x32xf32> -> vector<8x32xf32>
    %62 = arith.addf %36, %61 : vector<8x32xf32>
    %63 = vector.extract_strided_slice %4 {offsets = [0, 16], sizes = [8, 8], strides = [1, 1]} : vector<8x32xf32> to vector<8x8xf32>
    %64 = arith.truncf %63 : vector<8x8xf32> to vector<8x8xbf16>
    %65 = vector.extract_strided_slice %6 {offsets = [0, 16], sizes = [8, 8], strides = [1, 1]} : vector<8x32xf32> to vector<8x8xf32>
    %66 = arith.truncf %65 : vector<8x8xf32> to vector<8x8xbf16>
    %67 = vector.extract_strided_slice %8 {offsets = [0, 16], sizes = [8, 8], strides = [1, 1]} : vector<8x32xf32> to vector<8x8xf32>
    %68 = arith.truncf %67 : vector<8x8xf32> to vector<8x8xbf16>
    %cst_30 = arith.constant dense<0.000000e+00> : vector<8x8xf32>
    %69 = tpu.matmul %64, %66, %cst_30 {dimension_numbers = #tpu.dot_dimension_numbers<[1], [1], [0], [0], [0, 0, 1, 0], [], []>} : vector<8x8xbf16>, vector<8x8xbf16>, vector<8x8xf32> -> vector<8x8xf32>
    %cst_31 = arith.constant dense<0xFF800000> : vector<8xf32>
    %70 = vector.multi_reduction <maximumf>, %69, %cst_31 [1] : vector<8x8xf32> to vector<8xf32>
    %71 = vector.shape_cast %70 : vector<8xf32> to vector<8x1xf32>
    %72 = vector.broadcast %71 : vector<8x1xf32> to vector<8x8xf32>
    %73 = arith.subf %69, %72 : vector<8x8xf32>
    %74 = math.exp %73 : vector<8x8xf32>
    %cst_32 = arith.constant dense<0.000000e+00> : vector<8xf32>
    %75 = vector.multi_reduction <add>, %74, %cst_32 [1] : vector<8x8xf32> to vector<8xf32>
    %76 = vector.shape_cast %75 : vector<8xf32> to vector<8x1xf32>
    %77 = tpu.reciprocal %76 {approx = true} : vector<8x1xf32> -> vector<8x1xf32>
    %78 = vector.broadcast %77 : vector<8x1xf32> to vector<8x8xf32>
    %79 = arith.mulf %74, %78 : vector<8x8xf32>
    %c2 = arith.constant 2 : index
    %c0_33 = arith.constant 0 : index
    %c0_34 = arith.constant 0 : index
    %c0_35 = arith.constant 0 : index
    %80 = vector.load %arg16[%c2, %c0_33, %c0_34, %c0_35] : memref<4x1x8x8xf32, #tpu.memory_space<vmem>>, vector<1x1x8x8xf32>
    %81 = vector.shape_cast %80 : vector<1x1x8x8xf32> to vector<8x8xf32>
    %82 = vector.shape_cast %79 : vector<8x8xf32> to vector<1x1x8x8xf32>
    tpu.vector_store %arg16[%c2, %c0_33, %c0_34, %c0_35], %82 {strides = array<i32>} : memref<4x1x8x8xf32, #tpu.memory_space<vmem>>, vector<1x1x8x8xf32>,
    %83 = arith.truncf %79 : vector<8x8xf32> to vector<8x8xbf16>
    %cst_36 = arith.constant dense<0.000000e+00> : vector<8x8xf32>
    %84 = tpu.matmul %83, %68, %cst_36 {dimension_numbers = #tpu.dot_dimension_numbers<[1], [0], [0], [1], [0, 0, 1, 1], [], []>} : vector<8x8xbf16>, vector<8x8xbf16>, vector<8x8xf32> -> vector<8x8xf32>
    %85 = arith.truncf %84 : vector<8x8xf32> to vector<8x8xbf16>
    %86 = vector.extract_strided_slice %9 {offsets = [16, 0], sizes = [8, 32], strides = [1, 1]} : vector<32x32xbf16> to vector<8x32xbf16>
    %cst_37 = arith.constant dense<0.000000e+00> : vector<8x32xf32>
    %87 = tpu.matmul %85, %86, %cst_37 {dimension_numbers = #tpu.dot_dimension_numbers<[1], [0], [0], [1], [0, 0, 1, 1], [], []>} : vector<8x8xbf16>, vector<8x32xbf16>, vector<8x32xf32> -> vector<8x32xf32>
    %88 = arith.addf %62, %87 : vector<8x32xf32>
    %89 = vector.extract_strided_slice %4 {offsets = [0, 24], sizes = [8, 8], strides = [1, 1]} : vector<8x32xf32> to vector<8x8xf32>
    %90 = arith.truncf %89 : vector<8x8xf32> to vector<8x8xbf16>
    %91 = vector.extract_strided_slice %6 {offsets = [0, 24], sizes = [8, 8], strides = [1, 1]} : vector<8x32xf32> to vector<8x8xf32>
    %92 = arith.truncf %91 : vector<8x8xf32> to vector<8x8xbf16>
    %93 = vector.extract_strided_slice %8 {offsets = [0, 24], sizes = [8, 8], strides = [1, 1]} : vector<8x32xf32> to vector<8x8xf32>
    %94 = arith.truncf %93 : vector<8x8xf32> to vector<8x8xbf16>
    %cst_38 = arith.constant dense<0.000000e+00> : vector<8x8xf32>
    %95 = tpu.matmul %90, %92, %cst_38 {dimension_numbers = #tpu.dot_dimension_numbers<[1], [1], [0], [0], [0, 0, 1, 0], [], []>} : vector<8x8xbf16>, vector<8x8xbf16>, vector<8x8xf32> -> vector<8x8xf32>
    %cst_39 = arith.constant dense<0xFF800000> : vector<8xf32>
    %96 = vector.multi_reduction <maximumf>, %95, %cst_39 [1] : vector<8x8xf32> to vector<8xf32>
    %97 = vector.shape_cast %96 : vector<8xf32> to vector<8x1xf32>
    %98 = vector.broadcast %97 : vector<8x1xf32> to vector<8x8xf32>
    %99 = arith.subf %95, %98 : vector<8x8xf32>
    %100 = math.exp %99 : vector<8x8xf32>
    %cst_40 = arith.constant dense<0.000000e+00> : vector<8xf32>
    %101 = vector.multi_reduction <add>, %100, %cst_40 [1] : vector<8x8xf32> to vector<8xf32>
    %102 = vector.shape_cast %101 : vector<8xf32> to vector<8x1xf32>
    %103 = tpu.reciprocal %102 {approx = true} : vector<8x1xf32> -> vector<8x1xf32>
    %104 = vector.broadcast %103 : vector<8x1xf32> to vector<8x8xf32>
    %105 = arith.mulf %100, %104 : vector<8x8xf32>
    %c3 = arith.constant 3 : index
    %c0_41 = arith.constant 0 : index
    %c0_42 = arith.constant 0 : index
    %c0_43 = arith.constant 0 : index
    %106 = vector.load %arg16[%c3, %c0_41, %c0_42, %c0_43] : memref<4x1x8x8xf32, #tpu.memory_space<vmem>>, vector<1x1x8x8xf32>
    %107 = vector.shape_cast %106 : vector<1x1x8x8xf32> to vector<8x8xf32>
    %108 = vector.shape_cast %105 : vector<8x8xf32> to vector<1x1x8x8xf32>
    tpu.vector_store %arg16[%c3, %c0_41, %c0_42, %c0_43], %108 {strides = array<i32>} : memref<4x1x8x8xf32, #tpu.memory_space<vmem>>, vector<1x1x8x8xf32>,
    %109 = arith.truncf %105 : vector<8x8xf32> to vector<8x8xbf16>
    %cst_44 = arith.constant dense<0.000000e+00> : vector<8x8xf32>
    %110 = tpu.matmul %109, %94, %cst_44 {dimension_numbers = #tpu.dot_dimension_numbers<[1], [0], [0], [1], [0, 0, 1, 1], [], []>} : vector<8x8xbf16>, vector<8x8xbf16>, vector<8x8xf32> -> vector<8x8xf32>
    %111 = arith.truncf %110 : vector<8x8xf32> to vector<8x8xbf16>
    %112 = vector.extract_strided_slice %9 {offsets = [24, 0], sizes = [8, 32], strides = [1, 1]} : vector<32x32xbf16> to vector<8x32xbf16>
    %cst_45 = arith.constant dense<0.000000e+00> : vector<8x32xf32>
    %113 = tpu.matmul %111, %112, %cst_45 {dimension_numbers = #tpu.dot_dimension_numbers<[1], [0], [0], [1], [0, 0, 1, 1], [], []>} : vector<8x8xbf16>, vector<8x32xbf16>, vector<8x32xf32> -> vector<8x32xf32>
    %114 = arith.addf %88, %113 : vector<8x32xf32>
    %c0_46 = arith.constant 0 : index
    %c0_47 = arith.constant 0 : index
    %115 = vector.load %arg6[%c0_46, %c0_47] : memref<1x32xf32, #tpu.memory_space<vmem>>, vector<1x32xf32>
    %116 = vector.broadcast %115 : vector<1x32xf32> to vector<8x32xf32>
    %117 = arith.addf %114, %116 : vector<8x32xf32>
    %118 = arith.addf %117, %1 : vector<8x32xf32>
    %c0_48 = arith.constant 0 : index
    %c0_49 = arith.constant 0 : index
    %119 = vector.load %arg7[%c0_48, %c0_49] : memref<1x32xf32, #tpu.memory_space<vmem>>, vector<1x32xf32>
    %c0_50 = arith.constant 0 : index
    %c0_51 = arith.constant 0 : index
    %120 = vector.load %arg8[%c0_50, %c0_51] : memref<1x32xf32, #tpu.memory_space<vmem>>, vector<1x32xf32>
    %cst_52 = arith.constant dense<0.000000e+00> : vector<8xf32>
    %121 = vector.multi_reduction <add>, %118, %cst_52 [1] : vector<8x32xf32> to vector<8xf32>
    %122 = vector.shape_cast %121 : vector<8xf32> to vector<8x1xf32>
    %cst_53 = arith.constant 3.200000e+01 : f32
    %123 = vector.broadcast %cst_53 : f32 to vector<8x1xf32>
    %124 = arith.divf %122, %123 : vector<8x1xf32>
    %125 = vector.broadcast %124 : vector<8x1xf32> to vector<8x32xf32>
    %126 = arith.subf %118, %125 : vector<8x32xf32>
    %127 = arith.mulf %126, %126 : vector<8x32xf32>
    %cst_54 = arith.constant dense<0.000000e+00> : vector<8xf32>
    %128 = vector.multi_reduction <add>, %127, %cst_54 [1] : vector<8x32xf32> to vector<8xf32>
    %129 = vector.shape_cast %128 : vector<8xf32> to vector<8x1xf32>
    %cst_55 = arith.constant 0.0322580636 : f32
    %130 = vector.broadcast %cst_55 : f32 to vector<8x1xf32>
    %131 = arith.mulf %129, %130 : vector<8x1xf32>
    %132 = math.sqrt %131 : vector<8x1xf32>
    %cst_56 = arith.constant 1.000000e-03 : f32
    %133 = vector.broadcast %cst_56 : f32 to vector<8x1xf32>
    %134 = arith.addf %132, %133 : vector<8x1xf32>
    %135 = tpu.reciprocal %134 {approx = true} : vector<8x1xf32> -> vector<8x1xf32>
    %136 = vector.broadcast %124 : vector<8x1xf32> to vector<8x32xf32>
    %137 = arith.subf %118, %136 : vector<8x32xf32>
    %138 = vector.broadcast %135 : vector<8x1xf32> to vector<8x32xf32>
    %139 = arith.mulf %137, %138 : vector<8x32xf32>
    %140 = vector.broadcast %119 : vector<1x32xf32> to vector<8x32xf32>
    %141 = arith.mulf %139, %140 : vector<8x32xf32>
    %142 = vector.broadcast %120 : vector<1x32xf32> to vector<8x32xf32>
    %143 = arith.addf %141, %142 : vector<8x32xf32>
    %144 = arith.truncf %143 : vector<8x32xf32> to vector<8x32xbf16>
    %c0_57 = arith.constant 0 : index
    %c0_58 = arith.constant 0 : index
    %145 = vector.load %arg9[%c0_57, %c0_58] : memref<32x64xbf16, #tpu.memory_space<vmem>>, vector<32x64xbf16>
    %cst_59 = arith.constant dense<0.000000e+00> : vector<8x64xf32>
    %146 = tpu.matmul %144, %145, %cst_59 {dimension_numbers = #tpu.dot_dimension_numbers<[1], [0], [0], [1], [0, 0, 1, 1], [], []>} : vector<8x32xbf16>, vector<32x64xbf16>, vector<8x64xf32> -> vector<8x64xf32>
    %c0_60 = arith.constant 0 : index
    %c0_61 = arith.constant 0 : index
    %147 = vector.load %arg10[%c0_60, %c0_61] : memref<1x64xf32, #tpu.memory_space<vmem>>, vector<1x64xf32>
    %148 = vector.broadcast %147 : vector<1x64xf32> to vector<8x64xf32>
    %149 = arith.addf %146, %148 : vector<8x64xf32>
    %cst_62 = arith.constant 0.000000e+00 : f32
    %150 = vector.broadcast %cst_62 : f32 to vector<8x64xf32>
    %151 = arith.maximumf %149, %150 : vector<8x64xf32>
    %152 = arith.truncf %151 : vector<8x64xf32> to vector<8x64xbf16>
    %c0_63 = arith.constant 0 : index
    %c0_64 = arith.constant 0 : index
    %153 = vector.load %arg11[%c0_63, %c0_64] : memref<64x32xbf16, #tpu.memory_space<vmem>>, vector<64x32xbf16>
    %cst_65 = arith.constant dense<0.000000e+00> : vector<8x32xf32>
    %154 = tpu.matmul %152, %153, %cst_65 {dimension_numbers = #tpu.dot_dimension_numbers<[1], [0], [0], [1], [0, 0, 1, 1], [], []>} : vector<8x64xbf16>, vector<64x32xbf16>, vector<8x32xf32> -> vector<8x32xf32>
    %c0_66 = arith.constant 0 : index
    %c0_67 = arith.constant 0 : index
    %155 = vector.load %arg12[%c0_66, %c0_67] : memref<1x32xf32, #tpu.memory_space<vmem>>, vector<1x32xf32>
    %156 = vector.broadcast %155 : vector<1x32xf32> to vector<8x32xf32>
    %157 = arith.addf %154, %156 : vector<8x32xf32>
    %158 = arith.addf %157, %143 : vector<8x32xf32>
    %c0_68 = arith.constant 0 : index
    %c0_69 = arith.constant 0 : index
    %159 = vector.load %arg13[%c0_68, %c0_69] : memref<1x32xf32, #tpu.memory_space<vmem>>, vector<1x32xf32>
    %c0_70 = arith.constant 0 : index
    %c0_71 = arith.constant 0 : index
    %160 = vector.load %arg14[%c0_70, %c0_71] : memref<1x32xf32, #tpu.memory_space<vmem>>, vector<1x32xf32>
    %cst_72 = arith.constant dense<0.000000e+00> : vector<8xf32>
    %161 = vector.multi_reduction <add>, %158, %cst_72 [1] : vector<8x32xf32> to vector<8xf32>
    %162 = vector.shape_cast %161 : vector<8xf32> to vector<8x1xf32>
    %cst_73 = arith.constant 3.200000e+01 : f32
    %163 = vector.broadcast %cst_73 : f32 to vector<8x1xf32>
    %164 = arith.divf %162, %163 : vector<8x1xf32>
    %165 = vector.broadcast %164 : vector<8x1xf32> to vector<8x32xf32>
    %166 = arith.subf %158, %165 : vector<8x32xf32>
    %167 = arith.mulf %166, %166 : vector<8x32xf32>
    %cst_74 = arith.constant dense<0.000000e+00> : vector<8xf32>
    %168 = vector.multi_reduction <add>, %167, %cst_74 [1] : vector<8x32xf32> to vector<8xf32>
    %169 = vector.shape_cast %168 : vector<8xf32> to vector<8x1xf32>
    %cst_75 = arith.constant 0.0322580636 : f32
    %170 = vector.broadcast %cst_75 : f32 to vector<8x1xf32>
    %171 = arith.mulf %169, %170 : vector<8x1xf32>
    %172 = math.sqrt %171 : vector<8x1xf32>
    %cst_76 = arith.constant 1.000000e-03 : f32
    %173 = vector.broadcast %cst_76 : f32 to vector<8x1xf32>
    %174 = arith.addf %172, %173 : vector<8x1xf32>
    %175 = tpu.reciprocal %174 {approx = true} : vector<8x1xf32> -> vector<8x1xf32>
    %176 = vector.broadcast %164 : vector<8x1xf32> to vector<8x32xf32>
    %177 = arith.subf %158, %176 : vector<8x32xf32>
    %178 = vector.broadcast %175 : vector<8x1xf32> to vector<8x32xf32>
    %179 = arith.mulf %177, %178 : vector<8x32xf32>
    %180 = vector.broadcast %159 : vector<1x32xf32> to vector<8x32xf32>
    %181 = arith.mulf %179, %180 : vector<8x32xf32>
    %182 = vector.broadcast %160 : vector<1x32xf32> to vector<8x32xf32>
    %183 = arith.addf %181, %182 : vector<8x32xf32>
    %c0_77 = arith.constant 0 : index
    %c0_78 = arith.constant 0 : index
    %c0_79 = arith.constant 0 : index
    %184 = vector.load %arg15[%c0_77, %c0_78, %c0_79] : memref<1x8x32xf32, #tpu.memory_space<vmem>>, vector<1x8x32xf32>
    %185 = vector.shape_cast %184 : vector<1x8x32xf32> to vector<8x32xf32>
    %186 = vector.shape_cast %183 : vector<8x32xf32> to vector<1x8x32xf32>
    tpu.vector_store %arg15[%c0_77, %c0_78, %c0_79], %186 {strides = array<i32>} : memref<1x8x32xf32, #tpu.memory_space<vmem>>, vector<1x8x32xf32>,
    return
  }
  func.func @transform_0(%arg0: i32) -> (i32, i32, i32) {
    %c0_i32 = arith.constant 0 : i32
    %c0_i32_0 = arith.constant 0 : i32
    %c0_i32_1 = arith.constant 0 : i32
    return %arg0, %c0_i32, %c0_i32_0 : i32, i32, i32
  }
  func.func @transform_1(%arg0: i32) -> (i32, i32) {
    %c0_i32 = arith.constant 0 : i32
    %c0_i32_0 = arith.constant 0 : i32
    %c0_i32_1 = arith.constant 0 : i32
    return %c0_i32, %c0_i32_0 : i32, i32
  }
  func.func @transform_2(%arg0: i32) -> (i32, i32) {
    %c0_i32 = arith.constant 0 : i32
    %c0_i32_0 = arith.constant 0 : i32
    %c0_i32_1 = arith.constant 0 : i32
    return %c0_i32, %c0_i32_0 : i32, i32
  }
  func.func @transform_3(%arg0: i32) -> (i32, i32) {
    %c0_i32 = arith.constant 0 : i32
    %c0_i32_0 = arith.constant 0 : i32
    %c0_i32_1 = arith.constant 0 : i32
    return %c0_i32, %c0_i32_0 : i32, i32
  }
  func.func @transform_4(%arg0: i32) -> (i32, i32) {
    %c0_i32 = arith.constant 0 : i32
    %c0_i32_0 = arith.constant 0 : i32
    %c0_i32_1 = arith.constant 0 : i32
    return %c0_i32, %c0_i32_0 : i32, i32
  }
  func.func @transform_5(%arg0: i32) -> (i32, i32) {
    %c0_i32 = arith.constant 0 : i32
    %c0_i32_0 = arith.constant 0 : i32
    %c0_i32_1 = arith.constant 0 : i32
    return %c0_i32, %c0_i32_0 : i32, i32
  }
  func.func @transform_6(%arg0: i32) -> (i32, i32) {
    %c0_i32 = arith.constant 0 : i32
    %c0_i32_0 = arith.constant 0 : i32
    %c0_i32_1 = arith.constant 0 : i32
    return %c0_i32, %c0_i32_0 : i32, i32
  }
  func.func @transform_7(%arg0: i32) -> (i32, i32) {
    %c0_i32 = arith.constant 0 : i32
    %c0_i32_0 = arith.constant 0 : i32
    %c0_i32_1 = arith.constant 0 : i32
    return %c0_i32, %c0_i32_0 : i32, i32
  }
  func.func @transform_8(%arg0: i32) -> (i32, i32) {
    %c0_i32 = arith.constant 0 : i32
    %c0_i32_0 = arith.constant 0 : i32
    %c0_i32_1 = arith.constant 0 : i32
    return %c0_i32, %c0_i32_0 : i32, i32
  }
  func.func @transform_9(%arg0: i32) -> (i32, i32) {
    %c0_i32 = arith.constant 0 : i32
    %c0_i32_0 = arith.constant 0 : i32
    %c0_i32_1 = arith.constant 0 : i32
    return %c0_i32, %c0_i32_0 : i32, i32
  }
  func.func @transform_10(%arg0: i32) -> (i32, i32) {
    %c0_i32 = arith.constant 0 : i32
    %c0_i32_0 = arith.constant 0 : i32
    %c0_i32_1 = arith.constant 0 : i32
    return %c0_i32, %c0_i32_0 : i32, i32
  }
  func.func @transform_11(%arg0: i32) -> (i32, i32) {
    %c0_i32 = arith.constant 0 : i32
    %c0_i32_0 = arith.constant 0 : i32
    %c0_i32_1 = arith.constant 0 : i32
    return %c0_i32, %c0_i32_0 : i32, i32
  }
  func.func @transform_12(%arg0: i32) -> (i32, i32) {
    %c0_i32 = arith.constant 0 : i32
    %c0_i32_0 = arith.constant 0 : i32
    %c0_i32_1 = arith.constant 0 : i32
    return %c0_i32, %c0_i32_0 : i32, i32
  }
  func.func @transform_13(%arg0: i32) -> (i32, i32) {
    %c0_i32 = arith.constant 0 : i32
    %c0_i32_0 = arith.constant 0 : i32
    %c0_i32_1 = arith.constant 0 : i32
    return %c0_i32, %c0_i32_0 : i32, i32
  }
  func.func @transform_14(%arg0: i32) -> (i32, i32, i32) {
    %c0_i32 = arith.constant 0 : i32
    %c0_i32_0 = arith.constant 0 : i32
    %c0_i32_1 = arith.constant 0 : i32
    return %arg0, %c0_i32, %c0_i32_0 : i32, i32, i32
  }
  func.func @transform_15(%arg0: i32) -> (i32, i32, i32, i32) {
    %c0_i32 = arith.constant 0 : i32
    %c0_i32_0 = arith.constant 0 : i32
    %c0_i32_1 = arith.constant 0 : i32
    %c0_i32_2 = arith.constant 0 : i32
    return %c0_i32, %arg0, %c0_i32_0, %c0_i32_1 : i32, i32, i32, i32
  }
}

</mosaic_0001>

<bundles_post_ra>
// kernel: tpu_custom_call.1
= control target key start
LH: loop header
LB: loop body
LE: loop exit
PB: predicated region body
PF: predicated region fallthrough
CT: control target
= control target key end

     0   :  { %s2810_s0 = inlined_call_operand.vmem [shape: f32[2,8,32], index: 0, kind: input, shape index: {}]   ;;  %s2811_s1 = inlined_call_operand.vmem [shape: bf16[32,32], index: 1, kind: input, shape index: {}]   ;;  %s2812_s2 = inlined_call_operand.vmem [shape: bf16[32,32], index: 2, kind: input, shape index: {}]   ;;  %s2813_s3 = inlined_call_operand.hbm [shape: bf16[32,32], index: 3, kind: input, shape index: {}]   ;;  %s2814_s4 = inlined_call_operand.hbm [shape: bf16[32,32], index: 4, kind: input, shape index: {}]   ;;  %s2815_s5 = inlined_call_operand.vmem [shape: f32[1,32], index: 5, kind: input, shape index: {}]   ;;  %s2816_s6 = inlined_call_operand.vmem [shape: f32[1,32], index: 6, kind: input, shape index: {}]   ;;  %s2817_s7 = inlined_call_operand.vmem [shape: f32[1,32], index: 7, kind: input, shape index: {}]   ;;  %s2818_s8 = inlined_call_operand.hbm [shape: bf16[32,64], index: 8, kind: input, shape index: {}]   ;;  %s2819_s9 = inlined_call_operand.vmem [shape: f32[1,64], index: 9, kind: input, shape index: {}]   ;;  %s2820_s10 = inlined_call_operand.vmem [shape: bf16[64,32], index: 10, kind: input, shape index: {}]   ;;  %s2821_s11 = inlined_call_operand.vmem [shape: f32[1,32], index: 11, kind: input, shape index: {}]   ;;  %s2822_s12 = inlined_call_operand.vmem [shape: f32[1,32], index: 12, kind: input, shape index: {}]   ;;  %s2823_s13 = inlined_call_operand.vmem [shape: f32[1,32], index: 13, kind: input, shape index: {}]   ;;  %s2824_s14 = inlined_call_operand.hbm [shape: f32[2,8,32], index: 14, kind: output, shape index: {0}]   ;;  %s2825_s15 = inlined_call_operand.hbm [shape: f32[4,2,8,8], index: 15, kind: output, shape index: {1}]  }
   0x1   :  { %2839 = sst [smem:[#allocation22_spill]] %s2822_s12 }
   0x2   :  { %2840 = sst [smem:[#allocation23_spill]] %s2823_s13 }
   0x3   :  { %2841 = sst [smem:[#allocation24_spill]] %s2824_s14 }
   0x4   :  { %2842 = sst [smem:[#allocation25_spill]] %s2825_s15 }
   0x5   :  { %21 = vsyncpa [#allocation3], 0 }
   0x6   :  { %22 = vsyncpa [#allocation6], 0 }
   0x7   :  { %23 = vsyncpa [#allocation4], 0 }
   0x8   :  { %25 = vsyncpa [#allocation4 + $0x1], 0 }
   0x9   :  { %26 = vsyncpa [#allocation10], 0 }
   0xa   :  { %28 = vsyncpa [#allocation10 + $0x1], 0  ;;  %s2374_s18 = smov 0   ;;  %s2376_s19 = smov 0  }
   0xb   :  { %s2378_s20 = smov 0   ;;  %s2380_s21 = smov 0  }
   0xc LB: > { %2843 = sst [smem:[#allocation15_spill]] %s2265_s18  ;;  %s2395_s22 = sadd.s32 4294967295, %s2277_s21   ;;  %s2277_s21 = sphi %s2380_s21, %s2870_s21   ;;  %s2273_s20 = sphi %s2378_s20, %s2872_s20   ;;  %s2269_s19 = sphi %s2376_s19, %s2874_s19   ;;  %s2265_s18 = sphi %s2374_s18, %s2873_s18  }
   0xd   : > { %2844 = sst [smem:[#allocation16_spill]] %s2273_s20  ;;  %s1755_s23 = sadd.s32 4294967294, %s2277_s21  }
   0xe   : > { %2845 = sst [smem:[#allocation17_spill]] %s2277_s21  ;;  %s2399_s24 = sadd.s32 1, %s2277_s21  }
   0xf   : > { %2846 = sst [smem:[#allocation18_spill]] %s2399_s24  ;;  %s340_s25 = sadd.s32 1, %s2273_s20 }
  0x10   : > { %s337_s26 = ssub.s32 %s2277_s21, %s2399_s24  ;;  %p350_p0 = scmp.ne.s32.totalorder %s2273_s20, %s2269_s19 }
  0x11   : > { %p338_p1 = scmp.eq.s32.totalorder %s337_s26, 0  ;;  %p351_p2 = scmp.eq.s32.totalorder %s2395_s22, 1 }
  0x12   : > { %p356_p3 = scmp.ne.s32.totalorder %s2269_s19, %s2265_s18  ;;  %p357_p4 = scmp.eq.s32.totalorder %s1755_s23, 1 }
  0x13   : > { %s2410_s27 = scalar_select %p338_p1, %s2273_s20, %s340_s25  }
  0x14   : > { %p2412_p5 = por %p351_p2, %p350_p0  ;;  %p2416_p6 = por %p357_p4, %p356_p3 }
  0x15   : > { %2847 = sst [smem:[#allocation19_spill]] %s2410_s27  ;;  %p1756_p7 = scmp.ge.s32.totalorder %s2277_s21, 1 }
  0x16   : > { %s2848_s28 = scalar_select %p2412_p5, 1, 0 }
  0x17   : > { %s2850_s29 = scalar_select %p2416_p6, 1, 0 }
  0x18   : > { %2849 = sst [smem:[#allocation20_spill]] %s2848_s28  ;;  %p390_p8 = scmp.lt.s32.totalorder %s2277_s21, 3 }
  0x19   : > { %2851 = sst [smem:[#allocation21_spill]] %s2850_s29  ;;  %p2833_p9 = scmp.eq.s32.totalorder %s2395_s22, 0 }
  0x1a   : > { %p2423_p10 = pnand %p1756_p7, %p390_p8  ;;  %s2279_s16 = smov [#allocation5]  }
  0x1b   : > { %s421_s17 = sshll.u32 %s2279_s16, 4  ;;  %s2280_s25 = smov [#allocation2]   ;;  %s2429_s17 = int_to_ptr.vmem [resolvable:$true] %s421_s17 }
  0x1c   : > { %s2852_s30 = scalar_select %p2423_p10, 1, 0 }
  0x1d   : > { %p1986_p11 = pneg %p2423_p10  ;;  %s408_s26 = sshll.u32 %s2280_s25, 4  ;;  %s2437_s26 = int_to_ptr.vmem [resolvable:$true] %s408_s26 }
  0x1e   : > { %s2281_s27 = smov [#allocation7]   ;;  %s2091_s18 = scalar_lea.hbm %s2814_s4, 256 }
  0x1f   : > { %p2433_p12 = pnand %p2833_p9, %p1986_p11  ;;  %s2439_s20 = sshll.u32 %s2281_s27, 4  ;;  %s444_s20 = int_to_ptr.vmem [resolvable:$true] %s2439_s20 }
  0x20   : > { %p2092_p13 = scmp.ne.s32.totalorder %s2814_s4, %s2091_s18  ;;  %p2098_p3 = scmp.lt.u32.totalorder %s2091_s18, %s2814_s4 }
  0x21   : > { %p2449_p0 = pneg %p2433_p12 }
  0x23   : > { %p2094_p1 = pnand %p2449_p0, %p2092_p13 }
  0x25   : > { %p2095_p2 = pneg %p2094_p1 }
  0x27   : > { %p2100_p4 = pnand %p2098_p3, %p2095_p2 }
  0x29   : > { %2103 = shalt.err (!%p2100_p4)
}
  0x2a   : > { %s2104_s21 = scalar_lea.vmem %s2429_s17, 256  ;;  %p2112_p9 = scmp.lt.s32.totalorder %s2429_s17, %s2429_s17 }
  0x2b   : > { %p2105_p7 = scmp.ne.s32.totalorder %s2429_s17, %s2104_s21  ;;  %p2113_p6 = scmp.lt.s32.totalorder %s2104_s21, %s2104_s21 }
  0x2d   : > { %p2107_p8 = pnand %p2105_p7, %p2449_p0  ;;  %p2114_p13 = por %p2113_p6, %p2112_p9 }
  0x2f   : > { %p2108_p11 = pneg %p2107_p8 }
  0x31   : > { %p2115_p1 = pnand %p2114_p13, %p2108_p11 }
  0x33   : > { %2118 = shalt.err (!%p2115_p1)
}
  0x34   : > { %s2282_s24 = smov 64   ;;  %s2283_s18 = smov 4  }
  0x35   : > { %1992 = dma.hbm_to_vmem [thread:$0]  (!%p2433_p12), %s2814_s4, 256, %s2429_s17, [#allocation6], %s2282_s24, %s2282_s24, %s2283_s18  }
  0x36   : > { %s2119_s21 = scalar_lea.hbm %s2813_s3, 256 }
  0x37   : > { %p2120_p6 = scmp.ne.s32.totalorder %s2813_s3, %s2119_s21  ;;  %p2126_p3 = scmp.lt.u32.totalorder %s2119_s21, %s2813_s3 }
  0x39   : > { %p2122_p9 = pnand %p2120_p6, %p2449_p0 }
  0x3b   : > { %p2123_p2 = pneg %p2122_p9 }
  0x3d   : > { %p2128_p4 = pnand %p2126_p3, %p2123_p2 }
  0x3f   : > { %2131 = shalt.err (!%p2128_p4)
}
  0x40   : > { %s2132_s17 = scalar_lea.vmem %s2437_s26, 256  ;;  %p2140_p13 = scmp.lt.s32.totalorder %s2437_s26, %s2437_s26 }
  0x41   : > { %p2133_p7 = scmp.ne.s32.totalorder %s2437_s26, %s2132_s17  ;;  %p2141_p1 = scmp.lt.s32.totalorder %s2132_s17, %s2132_s17 }
  0x43   : > { %p2135_p8 = pnand %p2133_p7, %p2449_p0  ;;  %p2142_p6 = por %p2141_p1, %p2140_p13 }
  0x45   : > { %p2136_p11 = pneg %p2135_p8 }
  0x47   : > { %p2143_p9 = pnand %p2142_p6, %p2136_p11 }
  0x49   : > { %2146 = shalt.err (!%p2143_p9)
}
  0x4a   : > { %1989 = dma.hbm_to_vmem [thread:$0]  (!%p2433_p12), %s2813_s3, 256, %s2437_s26, [#allocation3], %s2282_s24, %s2282_s24, %s2283_s18  }
  0x4b   : > { %s2147_s29 = scalar_lea.hbm %s2818_s8, 256 }
  0x4c   : > { %p2148_p2 = scmp.ne.s32.totalorder %s2818_s8, %s2147_s29  ;;  %p2154_p7 = scmp.lt.u32.totalorder %s2147_s29, %s2818_s8 }
  0x4e   : > { %p2150_p3 = pnand %p2148_p2, %p2449_p0 }
  0x50   : > { %p2151_p4 = pneg %p2150_p3 }
  0x52   : > { %p2156_p8 = pnand %p2154_p7, %p2151_p4 }
  0x54   : > { %2159 = shalt.err (!%p2156_p8)
}
  0x55   : > { %s2160_s17 = scalar_lea.vmem %s444_s20, 256  ;;  %p2168_p6 = scmp.lt.s32.totalorder %s444_s20, %s444_s20 }
  0x56   : > { %p2161_p11 = scmp.ne.s32.totalorder %s444_s20, %s2160_s17  ;;  %p2169_p9 = scmp.lt.s32.totalorder %s2160_s17, %s2160_s17 }
  0x58   : > { %p2163_p13 = pnand %p2161_p11, %p2449_p0  ;;  %p2170_p5 = por %p2169_p9, %p2168_p6 }
  0x5a   : > { %p2164_p1 = pneg %p2163_p13 }
  0x5c   : > { %p2171_p10 = pnand %p2170_p5, %p2164_p1 }
  0x5e   : > { %2174 = shalt.err (!%p2171_p10)
}
  0x5f   : > { %1995 = dma.hbm_to_vmem [thread:$0]  (!%p2433_p12), %s2818_s8, 256, %s444_s20, [#allocation6], %s2282_s24, %s2282_s24, %s2283_s18  }
  0x60   : > { %p2855_p2 = scmp.ne.s32.totalorder %s2852_s30, 0 }
  0x61   : > { %p2856_p0 = scmp.eq.s32.totalorder (!%p2855_p2), %s2395_s22, 0 }
  0x62   : > { %481 = sbr.rel (%p2855_p2) target bundleno = 3816 (0xee8), region = 76 }
  0x69   : > { %2248 = dma.done.wait (%p2856_p0), [#allocation3], 256   ;;  %p2857_p3 = pmov %p2856_p0 }
  0x6a   : > { %p2858_p5 = pmov %p2856_p0 }
  0x6b   : > { %2250 = vsyncadd (%p2857_p3), [#allocation3], 4294967040 }
  0x6c   : > { %2252 = dma.done.wait (%p2858_p5), [#allocation6], 512   ;;  %p2859_p10 = pmov %p2856_p0 }
  0x6d   : > { %p541_p4 = scmp.lt.s32.totalorder %s2395_s22, 1  ;;  %v2284_v0 = vmov 0.0   ;;  %vm2285_vm0 = vmmov 0   ;;  %v2055_v1 = vld [vmem:[%s2811_s1] sm:$0xff]   ;;  %v2056_v2 = vld [vmem:[%s2811_s1 + $0x8] sm:$0xff]   ;;  %vm564_vm1 = vcmask 261120  }
  0x6e   : > { %2254 = vsyncadd (%p2859_p10), [#allocation6], 4294966784  ;;  %1854 = vmatprep.subr.bf16.mxu1 %v2284_v0  ;;  %1858 = vmatprep.mubr.msk.bf16.mxu1 %vm2285_vm0, %v2284_v0  ;;  %v2057_v4 = vld [vmem:[%s2812_s2] sm:$0xff]   ;;  %v2058_v6 = vld [vmem:[%s2812_s2 + $0x8] sm:$0xff]   ;;  %vm727_vm2 = vcmask 64512   ;;  %s2286_s21 = smov 120  }
  0x6f   : > { %s542_s14 = scalar_select %p541_p4, %s2395_s22, 1  ;;  %1870 = vmatprep.subr.bf16.mxu0 %v2284_v0  ;;  %1874 = vmatprep.mubr.msk.bf16.mxu0 %vm2285_vm0, %v2284_v0  ;;  %v2059_v18 = vld [vmem:[#allocation2] sm:$0xff]   ;;  %v2060_v19 = vld [vmem:[#allocation2 + $0x8] sm:$0xff]   ;;  %vm790_vm3 = vcmask 1043456   ;;  %v721_v53 = vld [vmem:[#allocation5 + $0x4] sm:$0xf] }
  0x70   : > { %1855 = vmatpush3.bf16.msra.mxu1 %v2055_v1  ;;  %1871 = vmatpush3.bf16.msra.mxu0 %v2059_v18  ;;  %s2287_s17 = smov 112   ;;  %s2608_s26 = sand.u32 1, %s2269_s19   ;;  %v955_v54 = vsel %vm790_vm3, %v721_v53, 0  ;;  %v720_v59 = vld [vmem:[#allocation5] sm:$0xf]  ;;  %vm1517_vm6 = vcmask 523264  }
  0x71   : > { %s1767_s20 = sshll.u32 %s542_s14, 3  ;;  %1856 = vmatprep.subr.bf16.mxu1 %v2284_v0  ;;  %1872 = vmatprep.subr.bf16.mxu0 %v2284_v0  ;;  %s1766_s12 = sshll.u32 %s2608_s26, 5  ;;  %v1001_v62 = vsel %vm790_vm3, %v720_v59, 0 }
  0x72   : > { %s544_s24 = scalar_lea.vmem %s2810_s0, %s1767_s20  ;;  %s2611_s14 = scalar_lea.vmem [#allocation9], %s1766_s12 }
  0x73   : > { %v2548_v3 = vld [vmem:[%s544_s24] sm:$0xff]  ;;  %s2288_s20 = smov 104   ;;  %s2860_s18 = sld [smem:[#allocation20_spill]] }
  0x74   : > { %v547_v5 = vpack.c.bf16 %v2548_v3, %v2548_v3  ;;  %1857 = vmatpush3.bf16.msra.mxu1 %v2056_v2  ;;  %1873 = vmatpush3.bf16.msra.mxu0 %v2060_v19  ;;  %s1809_s13 = sshll.u32 %s2395_s22, 7  ;;  %s2861_s29 = sld [smem:[#allocation25_spill]] }
  0x75   : > { %1862 = vmatprep.subr.bf16.mxu1 %v2284_v0  ;;  %1884 = vmatprep.subr.bf16.mxu0 %v2284_v0  ;;  %s1630_s25 = sshll.u32 %s2611_s14, 4  ;;  %s1605_s27 = scalar_lea.sflag [#allocation10], %s2608_s26  ;;  %s2728_s25 = int_to_ptr.vmem [resolvable:$true] %s1630_s25 }
  0x77   : > { %1859 = vmatmul.mubr.msk.bf16.vlgmr.msra.gmra.mrb[0].mxu1 %vm564_vm1, %v547_v5  ;;  %1875 = vmatmul.mubr.msk.bf16.vlgmr.msra.gmra.mrb[0].mxu0 %vm564_vm1, %v547_v5 }
  0x78   : > { %1863 = vmatpush3.bf16.msra.mxu1 %v2057_v4  ;;  %1866 = vmatprep.mubr.msk.bf16.mxu1 %vm2285_vm0, %v2284_v0 }
  0x79   : > { %1864 = vmatprep.subr.bf16.mxu1 %v2284_v0  ;;  %1886 = vmatprep.mubr.msk.bf16.mxu0 %vm2285_vm0, %v2284_v0  ;;  %p2862_p7 = scmp.ne.s32.totalorder %s2860_s18, 0 }
  0x7a   : > { %s2725_s16 = scalar_lea.hbm %s2861_s29, %s1809_s13 }
  0x7c   : > { %1865 = vmatpush3.bf16.msra.mxu1 %v2058_v6 }
  0x7d   : > { %1878 = vmatprep.subr.bf16.mxu1 %v2284_v0 }
  0x7f   : > { %1867 = vmatmul.mubr.msk.bf16.vlgmr.msra.gmra.mrb[4].mxu1 %vm564_vm1, %v547_v5 }
  0x80   : > { %1880 = vmatprep.mubr.msk.bf16.mxu1 %vm2285_vm0, %v2284_v0 }
 0x14a   : > { %v602_v7 = vpop.f32.mrb[0].mxu1  ;;  %v714_v36 = vpop.f32.mrb[0].mxu0 }
 0x14b   : > { %v1860_v8 = vpop.f32.mrb[1].mxu1  ;;  %v2574_v17 = vpack.c.bf16 %v602_v7, %v602_v7  ;;  %v1876_v37 = vpop.f32.mrb[1].mxu0  ;;  %v2596_v42 = vpack.c.bf16 %v714_v36, %v714_v36 }
 0x14c   : > { %v605_v9 = vpop.f32.mrb[2].mxu1  ;;  %v717_v38 = vpop.f32.mrb[2].mxu0 }
 0x14d   : > { %v1861_v10 = vpop.f32.mrb[3].mxu1  ;;  %v1877_v39 = vpop.f32.mrb[3].mxu0  ;;  %v792_v43 = vsel %vm790_vm3, %v2596_v42, 0 }
 0x14e   : > { %1885 = vmatpush3.bf16.msra.mxu0 %v792_v43 }
 0x14f   : > { %1896 = vmatprep.subr.bf16.mxu0 %v2284_v0 }
 0x152   : > { %v658_v11 = vpop.f32.mrb[4].mxu1 }
 0x153   : > { %v2568_v12 = vpack.c.bf16 %v658_v11, %v658_v11  ;;  %v1868_v13 = vpop.f32.mrb[5].mxu1 }
 0x154   : > { %v661_v14 = vpop.f32.mrb[6].mxu1 }
 0x155   : > { %839 = vrot.lane.b32.xlu0 %v2568_v12, %s2286_s21  ;;  %v1869_v15 = vpop.f32.mrb[7].mxu1  ;;  %v732_v16 = vsel %vm727_vm2, %v2568_v12, 0 }
 0x156   : > { %1879 = vmatpush3.bf16.xpose.msra.mxu1 %v732_v16 }
 0x157   : > { %1890 = vmatprep.subr.bf16.mxu1 %v2284_v0 }
 0x159   : > { %836 = vrot.lane.b32.xlu0 %v2574_v17, %s2286_s21 }
 0x15d   : > { %1881 = vmatmul.mubr.msk.bf16.vlgmr.msra.gmra.mrb[8].mxu1 %vm727_vm2, %v2574_v17 }
 0x15e   : > { %1892 = vmatprep.mubr.msk.bf16.mxu1 %vm2285_vm0, %v2284_v0 }
 0x1c7   : > { %v840_v20 = vpop.permute.xlu0 %839 }
 0x1c8   : > { %v845_v21 = vsel %vm727_vm2, %v840_v20, 0 }
 0x1c9   : > { %1891 = vmatpush3.bf16.xpose.msra.mxu1 %v845_v21 }
 0x1ca   : > { %1902 = vmatprep.subr.bf16.mxu1 %v2284_v0 }
 0x1cb   : > { %v837_v22 = vpop.permute.xlu0 %836 }
 0x1d0   : > { %1893 = vmatmul.mubr.msk.bf16.vlgmr.msra.gmra.mrb[12].mxu1 %vm727_vm2, %v837_v22 }
 0x1d1   : > { %1904 = vmatprep.mubr.msk.bf16.mxu1 %vm2285_vm0, %v2284_v0  ;;  %1903 = vmatpush3.bf16.msra.mxu1 %v955_v54 }
 0x1d2   : > { %1914 = vmatprep.subr.bf16.mxu1 %v2284_v0 }
 0x230   : > { %v768_v23 = vpop.f32.mrb[8].mxu1 }
 0x231   : > { %v1882_v24 = vpop.f32.mrb[9].mxu1  ;;  %v774_v25 = vsel %vm727_vm2, %v768_v23, -inf }
 0x232   : > { %775 = vmax.xlane.f32.xlu1 %v774_v25  ;;  %v771_v26 = vpop.f32.mrb[10].mxu1 }
 0x233   : > { %v1883_v27 = vpop.f32.mrb[11].mxu1 }
 0x2a3   : > { %v881_v28 = vpop.f32.mrb[12].mxu1 }
 0x2a4   : > { %v1894_v29 = vpop.f32.mrb[13].mxu1  ;;  %v887_v30 = vsel %vm727_vm2, %v881_v28, -inf }
 0x2a5   : > { %888 = vmax.xlane.f32.xlu1 %v887_v30  ;;  %v884_v31 = vpop.f32.mrb[14].mxu1 }
 0x2a6   : > { %v1895_v32 = vpop.f32.mrb[15].mxu1 }
 0x2bf   : > { %v776_v33 = vpop.xlane.xlu1 %775 }
 0x2c0   : > { %v777_v34 = vsub.f32 %v768_v23, %v776_v33 }
 0x2c2   : > { %v778_v35 = vmul.f32 1.442695, %v777_v34 }
 0x2c4   : > { %2067 = vpow2.f32 %v778_v35 }
 0x2ce   : > { %v2068_v40 = vpop.eup %2067 }
 0x2cf   : > { %v780_v41 = vsel %vm727_vm2, %v2068_v40, 0.0 }
 0x2d0   : > { %781 = vadd.xlane.f32.xlu0 %v780_v41 }
 0x2e6   : > { %1107 = vrot.lane.b32.xlu0 %v2596_v42, %s2287_s17 }
 0x332   : > { %v889_v44 = vpop.xlane.xlu1 %888 }
 0x333   : > { %v890_v45 = vsub.f32 %v881_v28, %v889_v44 }
 0x335   : > { %v891_v46 = vmul.f32 1.442695, %v890_v45 }
 0x337   : > { %2069 = vpow2.f32 %v891_v46 }
 0x341   : > { %v2070_v47 = vpop.eup %2069 }
 0x342   : > { %v893_v48 = vsel %vm727_vm2, %v2070_v47, 0.0 }
 0x343   : > { %894 = vadd.xlane.f32.xlu1 %v893_v48 }
 0x354   : > { %902 = vrot.lane.b32.xlu1 %v2596_v42, %s2286_s21  ;;  %s2175_s21 = scalar_lea.vmem %s2728_s25, 512 }
 0x355   : > { %p2176_p12 = scmp.ne.s32.totalorder %s2728_s25, %s2175_s21 }
 0x357   : > { %p2177_p8 = pnand %p2176_p12, %p2862_p7 }
 0x358   : > { %1045 = vrot.lane.b32.xlu1 %v2568_v12, %s2287_s17 }
 0x359   : > { %p2178_p11 = pneg %p2177_p8 }
 0x35c   : > { %1043 = vrot.lane.b32.xlu1 %v2574_v17, %s2287_s17  ;;  %s2289_s17 = smov [#allocation9]  }
 0x35d   : > { %v782_v49 = vpop.xlane.xlu0 %781  ;;  %s2179_s12 = sshll.u32 %s2289_s17, 4  ;;  %s2180_s12 = int_to_ptr.vmem [resolvable:$false] %s2179_s12 }
 0x35e   : > { %2071 = vrcp.f32 %v782_v49  ;;  %p2182_p13 = scmp.lt.s32.totalorder %s2728_s25, %s2180_s12 }
 0x361   : > { %v1108_v63 = vpop.permute.xlu0 %1107 }
 0x362   : > { %v1113_v6 = vsel %vm790_vm3, %v1108_v63, 0 }
 0x368   : > { %v2072_v50 = vpop.eup %2071 }
 0x369   : > { %v784_v51 = vmul.f32 %v2072_v50, %v2068_v40 }
 0x36b   : > { %v786_v52 = vpack.c.bf16 %v784_v51, %v784_v51  ;;  %785 = vst.msk [vmem:[%s2611_s14] sm:$0xff] %vm727_vm2, %v784_v51 }
 0x36d   : > { %1887 = vmatmul.mubr.msk.bf16.vlgmr.msra.gmra.mrb[4].mxu0 %vm727_vm2, %v786_v52 }
 0x36e   : > { %1898 = vmatprep.mubr.msk.bf16.mxu0 %vm2285_vm0, %v2284_v0 }
 0x3d0   : > { %v895_v55 = vpop.xlane.xlu1 %894 }
 0x3d1   : > { %2073 = vrcp.f32 %v895_v55 }
 0x3d4   : > { %v903_v56 = vpop.permute.xlu1 %902 }
 0x3d5   : > { %v908_v57 = vsel %vm790_vm3, %v903_v56, 0 }
 0x3d6   : > { %1897 = vmatpush3.bf16.msra.mxu0 %v908_v57 }
 0x3d7   : > { %1908 = vmatprep.subr.bf16.mxu0 %v2284_v0 }
 0x3d8   : > { %v1046_v8 = vpop.permute.xlu1 %1045 }
 0x3d9   : > { %v1051_v14 = vsel %vm727_vm2, %v1046_v8, 0 }
 0x3db   : > { %v2074_v58 = vpop.eup %2073 }
 0x3dc   : > { %v897_v60 = vmul.f32 %v2074_v58, %v2070_v47  ;;  %v1044_v16 = vpop.permute.xlu1 %1043 }
 0x3de   : > { %v900_v61 = vpack.c.bf16 %v897_v60, %v897_v60  ;;  %1780 = vst.msk [vmem:[%s2611_s14 + $0x8] sm:$0xff] %vm727_vm2, %v897_v60  ;;  %v723_v60 = vld [vmem:[#allocation5 + $0xc] sm:$0xf] }
 0x3e0   : > { %1899 = vmatmul.mubr.msk.bf16.vlgmr.msra.gmra.mrb[8].mxu0 %vm727_vm2, %v900_v61  ;;  %v1320_v61 = vsel %vm790_vm3, %v723_v60, 0 }
 0x3e1   : > { %1909 = vmatpush3.bf16.msra.mxu0 %v1001_v62  ;;  %1910 = vmatprep.mubr.msk.bf16.mxu0 %vm2285_vm0, %v2284_v0 }
 0x3e2   : > { %1920 = vmatprep.subr.bf16.mxu0 %v2284_v0 }
 0x440   : > { %v828_v1 = vpop.f32.mrb[4].mxu0 }
 0x441   : > { %v834_v2 = vpack.c.bf16 %v828_v1, %v828_v1  ;;  %v1888_v4 = vpop.f32.mrb[5].mxu0 }
 0x442   : > { %v831_v5 = vpop.f32.mrb[6].mxu0 }
 0x443   : > { %v1889_v7 = vpop.f32.mrb[7].mxu0  ;;  %1911 = vmatmul.mubr.msk.bf16.vlgmr.msra.gmra.mrb[12].mxu0 %vm727_vm2, %v834_v2 }
 0x444   : > { %1921 = vmatpush3.bf16.msra.mxu0 %v1113_v6  ;;  %1922 = vmatprep.mubr.msk.bf16.mxu0 %vm2285_vm0, %v2284_v0 }
 0x445   : > { %1932 = vmatprep.subr.bf16.mxu0 %v2284_v0 }
 0x4b3   : > { %v944_v9 = vpop.f32.mrb[8].mxu0 }
 0x4b4   : > { %v950_v10 = vpack.c.bf16 %v944_v9, %v944_v9  ;;  %v1900_v11 = vpop.f32.mrb[9].mxu0 }
 0x4b5   : > { %v947_v13 = vpop.f32.mrb[10].mxu0 }
 0x4b6   : > { %v1901_v15 = vpop.f32.mrb[11].mxu0  ;;  %1905 = vmatmul.mubr.msk.bf16.vlgmr.msra.gmra.mrb[16].mxu1 %vm727_vm2, %v950_v10 }
 0x4b7   : > { %1915 = vmatpush3.bf16.xpose.msra.mxu1 %v1051_v14  ;;  %1916 = vmatprep.mubr.msk.bf16.mxu1 %vm2285_vm0, %v2284_v0 }
 0x4b8   : > { %1926 = vmatprep.subr.bf16.mxu1 %v2284_v0 }
 0x4be   : > { %1917 = vmatmul.mubr.msk.bf16.vlgmr.msra.gmra.mrb[20].mxu1 %vm727_vm2, %v1044_v16 }
 0x4bf   : > { %1928 = vmatprep.mubr.msk.bf16.mxu1 %vm2285_vm0, %v2284_v0 }
 0x516   : > { %v1037_v18 = vpop.f32.mrb[12].mxu0 }
 0x517   : > { %v1912_v19 = vpop.f32.mrb[13].mxu0 }
 0x518   : > { %v1040_v20 = vpop.f32.mrb[14].mxu0 }
 0x519   : > { %v1913_v21 = vpop.f32.mrb[15].mxu0 }
 0x589   : > { %v991_v22 = vpop.f32.mrb[16].mxu1 }
 0x58a   : > { %v2642_v23 = vadd.f32 %v1037_v18, %v991_v22  ;;  %v1906_v24 = vpop.f32.mrb[17].mxu1  ;;  %v1792_v18 = vld [vmem:[%s2815_s5] ss:$0 sm:$0xff] }
 0x58b   : > { %v994_v25 = vpop.f32.mrb[18].mxu1 }
 0x58c   : > { %v1907_v26 = vpop.f32.mrb[19].mxu1 }
 0x591   : > { %v1087_v27 = vpop.f32.mrb[20].mxu1 }
 0x592   : > { %v1918_v28 = vpop.f32.mrb[21].mxu1  ;;  %v1093_v29 = vsel %vm727_vm2, %v1087_v27, -inf }
 0x593   : > { %1094 = vmax.xlane.f32.xlu1 %v1093_v29  ;;  %v1090_v30 = vpop.f32.mrb[22].mxu1 }
 0x594   : > { %v1919_v31 = vpop.f32.mrb[23].mxu1 }
 0x595   : > { %v2061_v31 = vld [vmem:[#allocation7] sm:$0xff]  }
 0x620   : > { %v1095_v32 = vpop.xlane.xlu1 %1094 }
 0x621   : > { %v1096_v33 = vsub.f32 %v1087_v27, %v1095_v32  ;;  %v2062_v32 = vld [vmem:[#allocation7 + $0x8] sm:$0xff]  }
 0x623   : > { %v1097_v34 = vmul.f32 1.442695, %v1096_v33  ;;  %v2064_v33 = vld [vmem:[%s2820_s10 + $0x8] sm:$0xff]  }
 0x625   : > { %2075 = vpow2.f32 %v1097_v34 }
 0x62f   : > { %v2076_v35 = vpop.eup %2075 }
 0x630   : > { %v1099_v36 = vsel %vm727_vm2, %v2076_v35, 0.0 }
 0x631   : > { %1100 = vadd.xlane.f32.xlu0 %v1099_v36 }
 0x647   : > { %1205 = vrot.lane.b32.xlu0 %v2568_v12, %s2288_s20 }
 0x64b   : > { %1203 = vrot.lane.b32.xlu0 %v2574_v17, %s2288_s20  ;;  %v722_v17 = vld [vmem:[#allocation5 + $0x8] sm:$0xf] }
 0x64c   : > { %v1160_v44 = vsel %vm790_vm3, %v722_v17, 0 }
 0x64d   : > { %1927 = vmatpush3.bf16.msra.mxu1 %v1160_v44  ;;  %v1794_v44 = vld [vmem:[%s2817_s7] ss:$0 sm:$0xff] }
 0x64e   : > { %1938 = vmatprep.subr.bf16.mxu1 %v2284_v0 }
 0x6be   : > { %v1101_v37 = vpop.xlane.xlu0 %1100 }
 0x6bf   : > { %2077 = vrcp.f32 %v1101_v37 }
 0x6c2   : > { %v1206_v40 = vpop.permute.xlu0 %1205 }
 0x6c3   : > { %v1211_v43 = vsel %vm727_vm2, %v1206_v40, 0 }
 0x6c6   : > { %v1204_v12 = vpop.permute.xlu0 %1203 }
 0x6c9   : > { %v2078_v38 = vpop.eup %2077 }
 0x6ca   : > { %v1103_v39 = vmul.f32 %v2078_v38, %v2076_v35 }
 0x6cc   : > { %v1106_v41 = vpack.c.bf16 %v1103_v39, %v1103_v39  ;;  %1785 = vst.msk [vmem:[%s2611_s14 + $0x10] sm:$0xff] %vm727_vm2, %v1103_v39 }
 0x6ce   : > { %1923 = vmatmul.mubr.msk.bf16.vlgmr.msra.gmra.mrb[16].mxu0 %vm727_vm2, %v1106_v41 }
 0x6cf   : > { %1933 = vmatpush3.bf16.xpose.msra.mxu0 %v1211_v43  ;;  %1934 = vmatprep.mubr.msk.bf16.mxu0 %vm2285_vm0, %v2284_v0 }
 0x6d0   : > { %1944 = vmatprep.subr.bf16.mxu0 %v2284_v0 }
 0x6d6   : > { %1935 = vmatmul.mubr.msk.bf16.vlgmr.msra.gmra.mrb[20].mxu0 %vm727_vm2, %v1204_v12  ;;  %v1793_v12 = vld [vmem:[%s2816_s6] ss:$0 sm:$0xff] }
 0x6d7   : > { %1946 = vmatprep.mubr.msk.bf16.mxu0 %vm2285_vm0, %v2284_v0  ;;  %1945 = vmatpush3.bf16.msra.mxu0 %v1320_v61 }
 0x6d8   : > { %1958 = vmatprep.subr.bf16.mxu0 %v2284_v0 }
 0x7a1   : > { %v1149_v45 = vpop.f32.mrb[16].mxu0 }
 0x7a2   : > { %v1155_v46 = vpack.c.bf16 %v1149_v45, %v1149_v45  ;;  %v1924_v47 = vpop.f32.mrb[17].mxu0 }
 0x7a3   : > { %v1152_v48 = vpop.f32.mrb[18].mxu0 }
 0x7a4   : > { %v1925_v49 = vpop.f32.mrb[19].mxu0  ;;  %1929 = vmatmul.mubr.msk.bf16.vlgmr.msra.gmra.mrb[24].mxu1 %vm727_vm2, %v1155_v46  ;;  %v2065_v48 = vld [vmem:[%s2820_s10 + $0x10] sm:$0xff]  }
 0x7a5   : > { %1940 = vmatprep.mubr.msk.bf16.mxu1 %vm2285_vm0, %v2284_v0  ;;  %v2066_v49 = vld [vmem:[%s2820_s10 + $0x18] sm:$0xff]  }
 0x7a9   : > { %v1247_v50 = vpop.f32.mrb[20].mxu0 }
 0x7aa   : > { %v1936_v51 = vpop.f32.mrb[21].mxu0  ;;  %v1253_v52 = vsel %vm727_vm2, %v1247_v50, -inf }
 0x7ab   : > { %1254 = vmax.xlane.f32.xlu0 %v1253_v52  ;;  %v1250_v53 = vpop.f32.mrb[22].mxu0 }
 0x7ac   : > { %v1937_v54 = vpop.f32.mrb[23].mxu0 }
 0x838   : > { %v1255_v55 = vpop.xlane.xlu0 %1254 }
 0x839   : > { %v1256_v56 = vsub.f32 %v1247_v50, %v1255_v55  ;;  %v1795_v50 = vld [vmem:[%s2819_s9] ss:$0 sm:$0xff] }
 0x83b   : > { %v1257_v57 = vmul.f32 1.442695, %v1256_v56 }
 0x83d   : > { %2079 = vpow2.f32 %v1257_v57 }
 0x847   : > { %v2080_v58 = vpop.eup %2079 }
 0x848   : > { %v1259_v59 = vsel %vm727_vm2, %v2080_v58, 0.0 }
 0x849   : > { %1260 = vadd.xlane.f32.xlu1 %v1259_v59 }
 0x85a   : > { %1267 = vrot.lane.b32.xlu1 %v2596_v42, %s2288_s20  ;;  %s2181_s20 = scalar_lea.vmem %s2180_s12, 1024 }
 0x85b   : > { %p2183_p1 = scmp.lt.s32.totalorder %s2181_s20, %s2175_s21 }
 0x85d   : > { %p2184_p6 = por %p2183_p1, %p2182_p13 }
 0x85f   : > { %p2185_p9 = pnand %p2184_p6, %p2178_p11 }
 0x877   : > { %v1196_v62 = vpop.f32.mrb[24].mxu1 }
 0x878   : > { %v1202_v63 = vadd.f32 %v1196_v62, %v2642_v23  ;;  %v1930_v1 = vpop.f32.mrb[25].mxu1 }
 0x879   : > { %v1199_v2 = vpop.f32.mrb[26].mxu1 }
 0x87a   : > { %v1931_v4 = vpop.f32.mrb[27].mxu1 }
 0x8d6   : > { %v1261_v5 = vpop.xlane.xlu1 %1260 }
 0x8d7   : > { %2081 = vrcp.f32 %v1261_v5 }
 0x8da   : > { %v1268_v6 = vpop.permute.xlu1 %1267 }
 0x8db   : > { %v1273_v7 = vsel %vm790_vm3, %v1268_v6, 0 }
 0x8dc   : > { %1939 = vmatpush3.bf16.msra.mxu1 %v1273_v7 }
 0x8dd   : > { %1950 = vmatprep.subr.bf16.mxu1 %v2284_v0 }
 0x8e1   : > { %v2082_v42 = vpop.eup %2081 }
 0x8e2   : > { %v1263_v8 = vmul.f32 %v2082_v42, %v2080_v58 }
 0x8e4   : > { %v1266_v9 = vpack.c.bf16 %v1263_v8, %v1263_v8  ;;  %1789 = vst.msk [vmem:[%s2611_s14 + $0x18] sm:$0xff] %vm727_vm2, %v1263_v8 }
 0x8e6   : > { %1941 = vmatmul.mubr.msk.bf16.vlgmr.msra.gmra.mrb[28].mxu1 %vm727_vm2, %v1266_v9 }
 0x8e7   : > { %1954 = vmatprep.mubr.msk.bf16.mxu1 %vm2285_vm0, %v2284_v0  ;;  %1951 = vmatpush3.bf16.msra.mxu1 %v2061_v31 }
 0x8e8   : > { %1952 = vmatprep.subr.bf16.mxu1 %v2284_v0 }
 0x8eb   : > { %1953 = vmatpush3.bf16.msra.mxu1 %v2062_v32 }
 0x9b9   : > { %v1309_v10 = vpop.f32.mrb[28].mxu1 }
 0x9ba   : > { %v1315_v11 = vpack.c.bf16 %v1309_v10, %v1309_v10  ;;  %v1942_v13 = vpop.f32.mrb[29].mxu1 }
 0x9bb   : > { %v1312_v14 = vpop.f32.mrb[30].mxu1 }
 0x9bc   : > { %v1943_v15 = vpop.f32.mrb[31].mxu1  ;;  %1947 = vmatmul.mubr.msk.bf16.vlgmr.msra.gmra.mrb[24].mxu0 %vm727_vm2, %v1315_v11 }
 0x9bd   : > { %1966 = vmatprep.mubr.msk.bf16.mxu0 %vm2285_vm0, %v2284_v0 }
 0xa8f   : > { %v1356_v16 = vpop.f32.mrb[24].mxu0 }
 0xa90   : > { %v1362_v19 = vadd.f32 %v1356_v16, %v1202_v63  ;;  %v1948_v20 = vpop.f32.mrb[25].mxu0 }
 0xa91   : > { %v1359_v21 = vpop.f32.mrb[26].mxu0 }
 0xa92   : > { %v1370_v22 = vadd.f32 %v1792_v18, %v1362_v19  ;;  %v1949_v23 = vpop.f32.mrb[27].mxu0 }
 0xa94   : > { %v1371_v24 = vadd.f32 %v1370_v22, %v2548_v3  ;;  %v2063_v3 = vld [vmem:[%s2820_s10] sm:$0xff]  }
 0xa95   : > { %1959 = vmatpush3.bf16.msra.mxu0 %v2063_v3 }
 0xa96   : > { %v1374_v25 = vsel %vm564_vm1, %v1371_v24, 0.0  ;;  %1960 = vmatprep.subr.bf16.mxu0 %v2284_v0 }
 0xa97   : > { %1375 = vadd.xlane.f32.xlu1 %v1374_v25 }
 0xa99   : > { %1961 = vmatpush3.bf16.msra.mxu0 %v2064_v33 }
 0xa9a   : > { %1962 = vmatprep.subr.bf16.mxu0 %v2284_v0 }
 0xa9d   : > { %1963 = vmatpush3.bf16.msra.mxu0 %v2065_v48 }
 0xa9e   : > { %1964 = vmatprep.subr.bf16.mxu0 %v2284_v0  ;;  %v1799_v0 = vld [vmem:[%s2821_s11] ss:$0 sm:$0xff] }
 0xaa1   : > { %1965 = vmatpush3.bf16.msra.mxu0 %v2066_v49 }
 0xb24   : > { %v1376_v26 = vpop.xlane.xlu1 %1375 }
 0xb25   : > { %v1378_v27 = vmul.f32 0.03125, %v1376_v26 }
 0xb27   : > { %v1379_v28 = vsub.f32 %v1371_v24, %v1378_v27 }
 0xb29   : > { %v1380_v29 = vmul.f32 %v1379_v28, %v1379_v28 }
 0xb2b   : > { %v1381_v30 = vsel %vm564_vm1, %v1380_v29, 0.0 }
 0xb2c   : > { %1382 = vadd.xlane.f32.xlu0 %v1381_v30 }
 0xbb9   : > { %v1383_v34 = vpop.xlane.xlu0 %1382 }
 0xbba   : > { %v1384_v35 = vmul.f32 0.032258064, %v1383_v34 }
 0xbbc   : > { %2083 = vrsqrt.f32 %v1384_v35  ;;  %vm1387_vm4 = vcmp.eq.f32.partialorder %v1384_v35, inf  ;;  %v1390_v38 = vand.u32 2147483648, %v1384_v35  ;;  %vm1389_vm5 = vcmp.eq.f32.partialorder %v1384_v35, 0.0 }
 0xbc6   : > { %v2084_v36 = vpop.eup %2083 }
 0xbc7   : > { %v1386_v37 = vmul.f32 %v2084_v36, %v1384_v35 }
 0xbc9   : > { %v1388_v39 = vsel %vm1387_vm4, %v1384_v35, %v1386_v37 }
 0xbca   : > { %v1391_v40 = vsel %vm1389_vm5, %v1390_v38, %v1388_v39 }
 0xbcb   : > { %v1392_v41 = vadd.f32 0.001, %v1391_v40 }
 0xbcd   : > { %2085 = vrcp.f32 %v1392_v41 }
 0xbd7   : > { %v2086_v43 = vpop.eup %2085 }
 0xbd8   : > { %v1394_v17 = vmul.f32 %v2086_v43, %v1379_v28 }
 0xbda   : > { %v1401_v45 = vmul.f32 %v1793_v12, %v1394_v17 }
 0xbdc   : > { %v1408_v46 = vadd.f32 %v1794_v44, %v1401_v45 }
 0xbde   : > { %v1409_v47 = vpack.c.bf16 %v1408_v46, %v1408_v46 }
 0xbe0   : > { %1955 = vmatmul.mubr.msk.bf16.vlgmr.msra.gmra.mrb[32].mxu1 %vm564_vm1, %v1409_v47 }
 0xcb3   : > { %v1470_v51 = vpop.f32.mrb[32].mxu1 }
 0xcb4   : > { %v1471_v52 = vadd.f32 %v1795_v50, %v1470_v51  ;;  %v1956_v53 = vpop.f32.mrb[33].mxu1 }
 0xcb5   : > { %v1473_v54 = vpop.f32.mrb[34].mxu1 }
 0xcb6   : > { %v1476_v55 = vmax.f32 %v1471_v52, 0.0  ;;  %v1957_v56 = vpop.f32.mrb[35].mxu1 }
 0xcb8   : > { %v1477_v57 = vpack.c.bf16 %v1476_v55, %v1476_v55 }
 0xcba   : > { %1967 = vmatmul.mubr.msk.bf16.vlgmr.msra.gmra.mrb[28].mxu0 %vm1517_vm6, %v1477_v57 }
 0xd8d   : > { %v1555_v58 = vpop.f32.mrb[28].mxu0 }
 0xd8e   : > { %v1556_v59 = vadd.f32 %v1799_v0, %v1555_v58  ;;  %v1968_v60 = vpop.f32.mrb[29].mxu0 }
 0xd8f   : > { %v1558_v61 = vpop.f32.mrb[30].mxu0 }
 0xd90   : > { %v1969_v62 = vpop.f32.mrb[31].mxu0  ;;  %v1561_v63 = vadd.f32 %v1556_v59, %v1408_v46 }
 0xd92   : > { %v1564_v1 = vsel %vm564_vm1, %v1561_v63, 0.0 }
 0xd93   : > { %1565 = vadd.xlane.f32.xlu0 %v1564_v1 }
 0xe20   : > { %v1566_v2 = vpop.xlane.xlu0 %1565 }
 0xe21   : > { %v1567_v4 = vmul.f32 0.03125, %v1566_v2 }
 0xe23   : > { %v1568_v5 = vsub.f32 %v1561_v63, %v1567_v4 }
 0xe25   : > { %v1569_v6 = vmul.f32 %v1568_v5, %v1568_v5 }
 0xe27   : > { %v1570_v7 = vsel %vm564_vm1, %v1569_v6, 0.0 }
 0xe28   : > { %1571 = vadd.xlane.f32.xlu0 %v1570_v7 }
 0xe29   : > { %2188 = shalt.err (!%p2185_p9)
}
 0xe2a   : > { %s2189_s14 = scalar_lea.hbm %s2725_s16, 512  ;;  %s2193_s24 = scalar_lea.hbm %s2861_s29, 1024 }
 0xe2b   : > { %p2190_p2 = scmp.ne.s32.totalorder %s2725_s16, %s2189_s14  ;;  %p2194_p5 = scmp.lt.u32.totalorder %s2725_s16, %s2861_s29 }
 0xe2c   : > { %p2195_p10 = scmp.lt.u32.totalorder %s2193_s24, %s2189_s14  ;;  %p2197_p12 = scmp.lt.u32.totalorder %s2189_s14, %s2725_s16 }
 0xe2d   : > { %p2191_p0 = pnand %p2190_p2, %p2862_p7 }
 0xe2e   : > { %p2196_p4 = por %p2195_p10, %p2194_p5 }
 0xe2f   : > { %p2192_p3 = pneg %p2191_p0 }
 0xe30   : > { %p2198_p8 = por %p2197_p12, %p2196_p4 }
 0xe32   : > { %p2199_p11 = pnand %p2198_p8, %p2192_p3 }
 0xe34   : > { %2202 = shalt.err (!%p2199_p11)
}
 0xe35   : > { %s2290_s21 = smov 128   ;;  %s2291_s17 = smov 256  }
 0xe36   : > { %s2292_s12 = smov 8   ;;  %s1765_s20 = sshll.u32 %s2608_s26, 3 }
 0xe37   : > { %1983 = dma.vmem_to_hbm [thread:$0]  (%p2862_p7), %s2728_s25, 512, %s2725_s16, %s1605_s27, %s2290_s21, %s2291_s17, %s2292_s12  }
 0xe38   : > { %s2863_s16 = sld [smem:[#allocation22_spill]]  ;;  %s2864_s23 = sld [smem:[#allocation23_spill]] }
 0xe39   : > { %s533_s24 = scalar_lea.vmem [#allocation8], %s1765_s20  ;;  %s2865_s17 = sld [smem:[#allocation24_spill]] }
 0xe3a   : > { %s1618_s15 = sshll.u32 %s533_s24, 4  ;;  %s1600_s14 = scalar_lea.sflag [#allocation4], %s2608_s26  ;;  %s2768_s15 = int_to_ptr.vmem [resolvable:$true] %s1618_s15 }
 0xe3b   : > { %s2203_s30 = scalar_lea.vmem %s2768_s15, 128  ;;  %s2293_s20 = smov [#allocation8]  }
 0xe3c   : > { %p2204_p13 = scmp.ne.s32.totalorder %s2768_s15, %s2203_s30  ;;  %s2207_s22 = sshll.u32 %s2293_s20, 4  ;;  %s2208_s22 = int_to_ptr.vmem [resolvable:$false] %s2207_s22 }
 0xe3d   : > { %p2210_p9 = scmp.lt.s32.totalorder %s2768_s15, %s2208_s22 }
 0xe3e   : > { %v1805_v18 = vld [vmem:[%s2863_s16] ss:$0 sm:$0xff]  ;;  %p2205_p1 = pnand %p2204_p13, %p2862_p7  ;;  %s2209_s16 = scalar_lea.vmem %s2208_s22, 256 }
 0xe3f   : > { %v1806_v20 = vld [vmem:[%s2864_s23] ss:$0 sm:$0xff]  ;;  %s2766_s12 = scalar_lea.hbm %s2865_s17, %s1809_s13  ;;  %p2211_p2 = scmp.lt.s32.totalorder %s2209_s16, %s2203_s30 }
 0xe40   : > { %p2206_p6 = pneg %p2205_p1 }
 0xe41   : > { %p2212_p0 = por %p2211_p2, %p2210_p9 }
 0xe43   : > { %p2213_p3 = pnand %p2212_p0, %p2206_p6 }
 0xeb5   : > { %v1572_v42 = vpop.xlane.xlu0 %1571 }
 0xeb6   : > { %v1573_v8 = vmul.f32 0.032258064, %v1572_v42 }
 0xeb8   : > { %2087 = vrsqrt.f32 %v1573_v8  ;;  %vm1576_vm7 = vcmp.eq.f32.partialorder %v1573_v8, inf  ;;  %v1579_v11 = vand.u32 2147483648, %v1573_v8  ;;  %vm1578_vm8 = vcmp.eq.f32.partialorder %v1573_v8, 0.0 }
 0xec2   : > { %v2088_v9 = vpop.eup %2087 }
 0xec3   : > { %v1575_v10 = vmul.f32 %v2088_v9, %v1573_v8 }
 0xec5   : > { %v1577_v13 = vsel %vm1576_vm7, %v1573_v8, %v1575_v10 }
 0xec6   : > { %v1580_v14 = vsel %vm1578_vm8, %v1579_v11, %v1577_v13 }
 0xec7   : > { %v1581_v15 = vadd.f32 0.001, %v1580_v14 }
 0xec9   : > { %2089 = vrcp.f32 %v1581_v15 }
 0xed3   : > { %v2090_v16 = vpop.eup %2089 }
 0xed4   : > { %v1583_v19 = vmul.f32 %v2090_v16, %v1568_v5 }
 0xed6   : > { %v1590_v21 = vmul.f32 %v1805_v18, %v1583_v19 }
 0xed8   : > { %v1597_v22 = vadd.f32 %v1806_v20, %v1590_v21 }
 0xeda   : > { %1598 = vst.msk [vmem:[%s533_s24] sm:$0xff] %vm564_vm1, %v1597_v22 }
 0xedb   : > { %2216 = shalt.err (!%p2213_p3)
}
 0xedc   : > { %s2217_s26 = scalar_lea.hbm %s2766_s12, 128  ;;  %s2221_s27 = scalar_lea.hbm %s2865_s17, 256 }
 0xedd   : > { %p2218_p5 = scmp.ne.s32.totalorder %s2766_s12, %s2217_s26  ;;  %p2222_p12 = scmp.lt.u32.totalorder %s2766_s12, %s2865_s17 }
 0xede   : > { %p2223_p8 = scmp.lt.u32.totalorder %s2221_s27, %s2217_s26  ;;  %p2225_p13 = scmp.lt.u32.totalorder %s2217_s26, %s2766_s12 }
 0xedf   : > { %p2219_p10 = pnand %p2218_p5, %p2862_p7 }
 0xee0   : > { %p2224_p11 = por %p2223_p8, %p2222_p12 }
 0xee1   : > { %p2220_p4 = pneg %p2219_p10 }
 0xee2   : > { %p2226_p1 = por %p2225_p13, %p2224_p11 }
 0xee4   : > { %p2227_p6 = pnand %p2226_p1, %p2220_p4 }
 0xee6   : > { %2230 = shalt.err (!%p2227_p6)
}
 0xee7   : > { %1982 = dma.vmem_to_hbm [thread:$0]  (%p2862_p7), %s2768_s15, 128, %s2766_s12, %s1600_s14  }
 0xee8 PF: > { %s2866_s28 = sld [smem:[#allocation17_spill]]  ;;  %s2867_s21 = sld [smem:[#allocation15_spill]] }
 0xee9   : > { %s2868_s30 = sld [smem:[#allocation21_spill]] }
 0xeee   : > { %p2009_p9 = scmp.ge.s32.totalorder %s2866_s28, 2  ;;  %s1645_s20 = sand.u32 1, %s2867_s21  }
 0xeef   : > { %p2869_p2 = scmp.ne.s32.totalorder %s2868_s30, 0  ;;  %s1646_s22 = scalar_lea.sflag [#allocation4], %s1645_s20 }
 0xef1   : > { %p1997_p0 = pnand %p2009_p9, %p2869_p2 }
 0xef3   : > { %2256 = dma.done.wait (!%p1997_p0), %s1646_s22, 128  }
 0xef4   : > { %2258 = vsyncadd (!%p1997_p0), %s1646_s22, 4294967168  ;;  %s1655_s16 = scalar_lea.sflag [#allocation10], %s1645_s20 }
 0xef5   : > { %2260 = dma.done.wait (!%p1997_p0), %s1655_s16, 512  }
 0xef6   : > { %2262 = vsyncadd (!%p1997_p0), %s1655_s16, 4294966784  ;;  %s2870_s21 = sld [smem:[#allocation18_spill]]  ;;  %s2871_s26 = sld [smem:[#allocation16_spill]] }
 0xef7   : > { %s2872_s20 = sld [smem:[#allocation19_spill]]  ;;  %s2873_s18 = smov %s2269_s19 }
 0xefc   : > { %p31_p7 = scmp.ge.s32.totalorder %s2870_s21, 4   ;;  %s2874_s19 = smov %s2871_s26 }
 0xefe   :  { %33 = sbr.rel (!%p31_p7) target bundleno = 12 (0xc), region = 144 }
 0xf05   :  { %1660 = vsyncpa [#allocation3], 1 }
 0xf06   :  { %1662 = vsyncpa [#allocation3 + $0x1], 1 }
 0xf07   :  { %1663 = vsyncpa [#allocation6], 1 }
 0xf08   :  { %1664 = vsyncpa [#allocation4], 1 }
 0xf09   :  { %1666 = vsyncpa [#allocation4 + $0x1], 1 }
 0xf0a   :  { %1667 = vsyncpa [#allocation10], 1 }
 0xf0b   :  { %1669 = vsyncpa [#allocation10 + $0x1], 1 }

</bundles_post_ra>
